<compile_context>
chip_gen: v7x
topology: tpu7x:2x2x1
jax: 0.10.0
libtpu: 0.0.40
codegen_flags: <defaults>
</compile_context>

<pallas_src>
import math
from functools import partial

import jax
import jax.numpy as jnp
from jax import lax
from jax.experimental import pallas as pl
from jax.experimental.pallas import tpu as pltpu


# ----------------------------- Pallas kernel -------------------------------

def _decode_kernel(xyz_ref, reg_ref, out_ref, *,
                   loc_scope, loc_bin_size, num_head_bin, anchor_size,
                   get_xz_fine, get_ry_fine, add_half_h):
    # xyz_ref: (3, TN), reg_ref: (C, TN) native dtype, out_ref: (8, TN) f32.
    per = int(loc_scope / loc_bin_size) * 2
    nh = int(num_head_bin)

    def row(r):
        # One channel row, lane-dense over the point tile.  Static slice.
        return reg_ref[r:r + 1, :]

    def argmax_only(bin_off, nb):
        # Running first-occurrence argmax over nb channel rows (strict '>').
        best_val = row(bin_off)
        best_idx = jnp.zeros(best_val.shape, jnp.float32)
        for k in range(1, nb):
            v = row(bin_off + k)
            take = v > best_val
            best_val = jnp.where(take, v, best_val)
            best_idx = jnp.where(take, jnp.float32(k), best_idx)
        return best_idx

    def argmax_gather(bin_off, res_off, nb):
        # Fused running argmax + residual select: one pass, no iota, no
        # second reduction over the residual slab.
        best_val = row(bin_off)
        best_idx = jnp.zeros(best_val.shape, jnp.float32)
        best_res = row(res_off)
        for k in range(1, nb):
            v = row(bin_off + k)
            take = v > best_val
            best_val = jnp.where(take, v, best_val)
            best_idx = jnp.where(take, jnp.float32(k), best_idx)
            best_res = jnp.where(take, row(res_off + k), best_res)
        return best_idx, best_res.astype(jnp.float32)

    x0 = xyz_ref[0:1, :].astype(jnp.float32)
    y0 = xyz_ref[1:2, :].astype(jnp.float32)
    z0 = xyz_ref[2:3, :].astype(jnp.float32)

    # ---- x / z bin classification (+ optional fine residual) ----
    if get_xz_fine:
        x_bin, x_resn = argmax_gather(0, 2 * per, per)
        z_bin, z_resn = argmax_gather(per, 3 * per, per)
        start = 4 * per
        pos_x = (x_bin + 0.5 + x_resn) * loc_bin_size - loc_scope + x0
        pos_z = (z_bin + 0.5 + z_resn) * loc_bin_size - loc_scope + z0
    else:
        x_bin = argmax_only(0, per)
        z_bin = argmax_only(per, per)
        start = 2 * per
        pos_x = (x_bin + 0.5) * loc_bin_size - loc_scope + x0
        pos_z = (z_bin + 0.5) * loc_bin_size - loc_scope + z0

    # ---- y offset (get_y_by_bin=False path, module default) ----
    pos_y = y0 + row(start).astype(jnp.float32)
    start += 1

    # ---- yaw (ry) decode ----
    ry_bin, ry_resn = argmax_gather(start, start + nh, nh)
    if get_ry_fine:
        apc = math.pi / 2 / nh
        ry = ry_bin * apc + (apc / 2) + ry_resn * (apc / 2) - math.pi / 4
    else:
        apc = 2 * math.pi / nh
        ry = (ry_bin * apc + ry_resn * (apc / 2)) % (2 * math.pi)
        ry = jnp.where(ry > math.pi, ry - 2 * math.pi, ry)

    # ---- size decode (anchor as python floats -> pure per-row FMA) ----
    size_start = start + 2 * nh
    anchor = tuple(float(a) for a in anchor_size)
    a3 = anchor if len(anchor) == 3 else (anchor[0],) * 3
    h = row(size_start + 0).astype(jnp.float32) * a3[0] + a3[0]
    w = row(size_start + 1).astype(jnp.float32) * a3[1] + a3[1]
    l = row(size_start + 2).astype(jnp.float32) * a3[2] + a3[2]

    # ---- post_process: proposals[..., 1] += proposals[..., 3] / 2 ----
    if add_half_h:
        pos_y = pos_y + h * 0.5

    # ---- direct lane-dense row stores into the (8, TN) output block ----
    out_ref[0:1, :] = pos_x
    out_ref[1:2, :] = pos_y
    out_ref[2:3, :] = pos_z
    out_ref[3:4, :] = h
    out_ref[4:5, :] = w
    out_ref[5:6, :] = l
    out_ref[6:7, :] = ry
    out_ref[7:8, :] = jnp.zeros_like(pos_x)     # pad row (keeps block full)


# ------------------------------ host helpers --------------------------------

def _round_up(x, m):
    return ((x + m - 1) // m) * m


def _choose_tile(n, tile_n):
    """Tile (multiple of 128) along the point axis.

    No "grid >= 2" cap (single-TC v5e/v6e gains nothing from it); when the grid
    would be odd we shrink the tile slightly so the grid is even, which gives
    v7x's two TensorCores an even work split under dimension_semantics
    ("parallel",).
    """
    n128 = max(128, _round_up(n, 128))
    tile = min(max(128, _round_up(int(tile_n), 128)), n128)
    grid = -(-n // tile)
    if grid > 1 and grid % 2 == 1:
        alt = max(128, _round_up(-(-n // (grid + 1)), 128))
        if -(-n // alt) == grid + 1:
            tile = alt
    return tile


def _vmem_limit_bytes(tile, c, reg_itemsize):
    # Double-buffered IO blocks + f32 temporaries headroom.  Only override the
    # compiler's default scoped-VMEM limit when we actually need more.
    need = 2 * (tile * c * reg_itemsize + tile * 3 * 4 + tile * 8 * 4)
    need += 4 * 1024 * 1024
    return int(need) if need > 12 * 1024 * 1024 else None


def decode_bbox_pallas(xyz_cm, reg_cm, *, loc_scope, loc_bin_size, num_head_bin,
                       anchor_size, get_xz_fine, get_ry_fine, add_half_h,
                       tile_n=4096):
    """Channel-major decode.  xyz_cm: (3, N), reg_cm: (C, N).  Returns (7, N)."""
    C, N = reg_cm.shape
    assert xyz_cm.shape == (3, N)

    tile = _choose_tile(N, tile_n)
    grid = -(-N // tile)
    np_out = grid * tile

    kernel = partial(_decode_kernel,
                     loc_scope=float(loc_scope), loc_bin_size=float(loc_bin_size),
                     num_head_bin=int(num_head_bin),
                     anchor_size=tuple(float(a) for a in anchor_size),
                     get_xz_fine=bool(get_xz_fine), get_ry_fine=bool(get_ry_fine),
                     add_half_h=bool(add_half_h))

    out_cm = pl.pallas_call(
        kernel,
        out_shape=jax.ShapeDtypeStruct((8, np_out), jnp.float32),
        grid=(grid,),
        in_specs=[pl.BlockSpec((3, tile), lambda i: (0, i)),
                  pl.BlockSpec((C, tile), lambda i: (0, i))],
        out_specs=pl.BlockSpec((8, tile), lambda i: (0, i)),
        compiler_params=pltpu.CompilerParams(
            dimension_semantics=("parallel",),
            vmem_limit_bytes=_vmem_limit_bytes(tile, C, reg_cm.dtype.itemsize)),
    )(xyz_cm, reg_cm)

    # Columns >= N of the last partial block are garbage (OOB reads); the
    # decode is strictly per-column, so slicing them off here is safe.
    return out_cm[:7, :N]                       # (7, N) channel-major


# ------------------------- ProposalLayer wrapper ----------------------------

class ProposalLayerPallas:
    def __init__(self, nms_pre=9000, nms_post=512, nms_thres=0.85,
                 nms_post_val=None, nms_thres_val=None, mean_size=(1.0,),
                 loc_xz_fine=True, loc_scope=3.0, loc_bin_size=0.5,
                 num_head_bin=12, get_y_by_bin=False, get_ry_fine=False,
                 loc_y_scope=0.5, loc_y_bin_size=0.25, post_process=True,
                 tile_n=4096):
        assert not get_y_by_bin, "get_y_by_bin=False path implemented (module default)"
        self.nms_pre = nms_pre
        self.nms_post = nms_post
        self.nms_thres = nms_thres
        self.mean_size = tuple(float(v) for v in mean_size)
        self.loc_scope = loc_scope
        self.loc_bin_size = loc_bin_size
        self.num_head_bin = num_head_bin
        self.loc_xz_fine = loc_xz_fine
        self.get_ry_fine = get_ry_fine
        self.post_process = post_process
        self.tile_n = tile_n
        self._forward = jax.jit(self._forward_impl)

    @property
    def reg_channels(self):
        per_loc_bin_num = int(self.loc_scope / self.loc_bin_size) * 2
        c = per_loc_bin_num * 2
        if self.loc_xz_fine:
            c += per_loc_bin_num * 2
        c += 1                       # y offset
        c += 2 * self.num_head_bin   # ry bin + res
        c += 3                       # size residual
        return c

    def __call__(self, rpn_scores, rpn_reg, xyz):
        return self._forward(rpn_scores, rpn_reg, xyz)

    def _forward_impl(self, rpn_scores, rpn_reg, xyz):
        B, NPTS, _ = xyz.shape
        C = rpn_reg.shape[-1]

        # Channel-major flatten.  NOTE: PointRCNN's RPN head emits (B, C, N)
        # natively; if you have that layout, pass it straight through and drop
        # these transposes.
        reg_cm = jnp.transpose(rpn_reg, (2, 0, 1)).reshape(C, B * NPTS)
        xyz_cm = jnp.transpose(xyz, (2, 0, 1)).reshape(3, B * NPTS)

        props_cm = decode_bbox_pallas(
            xyz_cm, reg_cm,
            loc_scope=self.loc_scope, loc_bin_size=self.loc_bin_size,
            num_head_bin=self.num_head_bin, anchor_size=self.mean_size,
            get_xz_fine=self.loc_xz_fine, get_ry_fine=self.get_ry_fine,
            add_half_h=self.post_process, tile_n=self.tile_n)       # (7, B*NPTS)
        proposals_cm = props_cm.reshape(7, B, NPTS).transpose(1, 0, 2)  # (B, 7, NPTS)

        if not self.post_process:
            # TODO(synk): rotated-BEV NMS (nms / xywhr_to_xyxyr) is
            # data-dependent / dynamic-shape; return raw proposals instead.
            return jnp.transpose(proposals_cm, (0, 2, 1)), rpn_scores

        # TODO(synk): distance-based rotated-BEV NMS (distance_based_proposal)
        # is data-dependent / dynamic-shape; we keep the top-nms_post by score.
        n_keep = min(self.nms_post, NPTS)
        scores_topk, idx = lax.top_k(rpn_scores, n_keep)         # sorted descending
        props_topk_cm = jnp.take_along_axis(proposals_cm, idx[:, None, :], axis=2)

        ret_bbox3d = jnp.zeros((B, self.nms_post, 7), jnp.float32)
        ret_scores = jnp.zeros((B, self.nms_post), jnp.float32)
        ret_bbox3d = ret_bbox3d.at[:, :n_keep, :].set(
            jnp.transpose(props_topk_cm, (0, 2, 1)).astype(jnp.float32))
        ret_scores = ret_scores.at[:, :n_keep].set(scores_topk.astype(jnp.float32))
        return ret_bbox3d, ret_scores


# ---------------------- pure-JAX reference (for check) ----------------------

def decode_ref(xyz_flat, reg, *, loc_scope, loc_bin_size, num_head_bin,
               anchor_size, get_xz_fine, get_ry_fine, add_half_h):
    per = int(loc_scope / loc_bin_size) * 2
    x_bin = jnp.argmax(reg[:, 0:per], axis=1)
    z_bin = jnp.argmax(reg[:, per:2 * per], axis=1)
    pos_x = x_bin.astype(jnp.float32) * loc_bin_size + loc_bin_size / 2 - loc_scope
    pos_z = z_bin.astype(jnp.float32) * loc_bin_size + loc_bin_size / 2 - loc_scope
    start = 2 * per
    if get_xz_fine:
        x_res = jnp.take_along_axis(reg[:, 2 * per:3 * per], x_bin[:, None], 1)[:, 0]
        z_res = jnp.take_along_axis(reg[:, 3 * per:4 * per], z_bin[:, None], 1)[:, 0]
        pos_x = pos_x + x_res * loc_bin_size
        pos_z = pos_z + z_res * loc_bin_size
        start = 4 * per
    pos_y = xyz_flat[:, 1] + reg[:, start]
    start += 1
    ry_bin = jnp.argmax(reg[:, start:start + num_head_bin], axis=1)
    ry_res_norm = jnp.take_along_axis(
        reg[:, start + num_head_bin:start + 2 * num_head_bin], ry_bin[:, None], 1)[:, 0]
    if get_ry_fine:
        apc = math.pi / 2 / num_head_bin
        ry = ry_bin.astype(jnp.float32) * apc + apc / 2 + ry_res_norm * (apc / 2) - math.pi / 4
    else:
        apc = 2 * math.pi / num_head_bin
        ry = (ry_bin.astype(jnp.float32) * apc + ry_res_norm * (apc / 2)) % (2 * math.pi)
        ry = jnp.where(ry > math.pi, ry - 2 * math.pi, ry)
    ss = start + 2 * num_head_bin
    anchor = jnp.asarray(anchor_size, jnp.float32)
    hwl = reg[:, ss:ss + 3] * anchor + anchor
    pos_x = pos_x + xyz_flat[:, 0]
    pos_z = pos_z + xyz_flat[:, 2]
    if add_half_h:
        pos_y = pos_y + hwl[:, 0] * 0.5
    return jnp.concatenate([pos_x[:, None], pos_y[:, None], pos_z[:, None],
                            hwl, ry[:, None]], axis=1)


# --------------------------------- main -------------------------------------

if __name__ == "__main__":
    key = jax.random.PRNGKey(0)
    B, NPTS = 2, 512

    layer = ProposalLayerPallas(nms_pre=256, nms_post=64, mean_size=(1.0,))
    C = layer.reg_channels  # 76 with defaults

    k1, k2, k3 = jax.random.split(key, 3)
    xyz = jax.random.normal(k1, (B, NPTS, 3), jnp.float32) * 5.0
    rpn_reg = jax.random.normal(k2, (B, NPTS, C), jnp.float32)
    rpn_scores = jax.random.normal(k3, (B, NPTS), jnp.float32)

    # full forward (jitted wrapper + Pallas decode kernel)
    ret_bbox3d, ret_scores = layer(rpn_scores, rpn_reg, xyz)
    jax.block_until_ready(ret_bbox3d)
    jax.block_until_ready(ret_scores)

    cfg = dict(loc_scope=layer.loc_scope, loc_bin_size=layer.loc_bin_size,
               num_head_bin=layer.num_head_bin, anchor_size=layer.mean_size,
               get_xz_fine=layer.loc_xz_fine, get_ry_fine=layer.get_ry_fine,
               add_half_h=True)

    xyz_flat = xyz.reshape(-1, 3)
    reg_flat = rpn_reg.reshape(-1, C)

    # verify the Pallas decode against a pure-JAX reference (f32 input)
    props_kernel = decode_bbox_pallas(xyz_flat.T, reg_flat.T, **cfg).T
    props_ref = decode_ref(xyz_flat, reg_flat, **cfg)
    assert jnp.allclose(props_kernel, props_ref, atol=1e-4, rtol=1e-4), "decode mismatch (f32)"

    # bf16 regression: kernel scans in bf16 (exact same compares as an f32
    # upcast) and upcasts only selected residuals -> halves HBM read bytes.
    reg_bf16 = reg_flat.astype(jnp.bfloat16)
    props_bf16 = decode_bbox_pallas(xyz_flat.T, reg_bf16.T, **cfg).T
    props_bf16_ref = decode_ref(xyz_flat, reg_bf16.astype(jnp.float32), **cfg)
    assert jnp.allclose(props_bf16, props_bf16_ref, atol=1e-4, rtol=1e-4), "decode mismatch (bf16)"

    print("KERNEL_OK")
</pallas_src>

<mosaic_0001>
module attributes {stable_mosaic.version = 11 : i64} {
  func.func @_decode_kernel(%arg0: i32, %arg1: memref<3x1024xf32, #tpu.memory_space<vmem>>, %arg2: memref<76x1024xf32, #tpu.memory_space<vmem>>, %arg3: memref<8x1024xf32, #tpu.memory_space<vmem>>) attributes {dimension_semantics = [#tpu.dimension_semantics<parallel>], iteration_bounds = array<i64: 1>, scalar_prefetch = 0 : i64, scratch_operands = 0 : i64, tpu.core_type = #tpu.core_type<tc>, window_params = [{transform_indices = @transform_0, window_bounds = array<i64: 3, 1024>}, {transform_indices = @transform_1, window_bounds = array<i64: 76, 1024>}, {transform_indices = @transform_2, window_bounds = array<i64: 8, 1024>}]} {
    %c0 = arith.constant 0 : index
    %c0_0 = arith.constant 0 : index
    %0 = vector.load %arg1[%c0, %c0_0] : memref<3x1024xf32, #tpu.memory_space<vmem>>, vector<1x1024xf32>
    %c1 = arith.constant 1 : index
    %c0_1 = arith.constant 0 : index
    %1 = vector.load %arg1[%c1, %c0_1] : memref<3x1024xf32, #tpu.memory_space<vmem>>, vector<1x1024xf32>
    %c2 = arith.constant 2 : index
    %c0_2 = arith.constant 0 : index
    %2 = vector.load %arg1[%c2, %c0_2] : memref<3x1024xf32, #tpu.memory_space<vmem>>, vector<1x1024xf32>
    %c0_3 = arith.constant 0 : index
    %c0_4 = arith.constant 0 : index
    %3 = vector.load %arg2[%c0_3, %c0_4] : memref<76x1024xf32, #tpu.memory_space<vmem>>, vector<1x1024xf32>
    %cst = arith.constant 0.000000e+00 : f32
    %4 = vector.broadcast %cst : f32 to vector<1x1024xf32>
    %c24 = arith.constant 24 : index
    %c0_5 = arith.constant 0 : index
    %5 = vector.load %arg2[%c24, %c0_5] : memref<76x1024xf32, #tpu.memory_space<vmem>>, vector<1x1024xf32>
    %c1_6 = arith.constant 1 : index
    %c0_7 = arith.constant 0 : index
    %6 = vector.load %arg2[%c1_6, %c0_7] : memref<76x1024xf32, #tpu.memory_space<vmem>>, vector<1x1024xf32>
    %7 = arith.cmpf ogt, %6, %3 : vector<1x1024xf32>
    %8 = arith.select %7, %6, %3 : vector<1x1024xi1>, vector<1x1024xf32>
    %cst_8 = arith.constant 1.000000e+00 : f32
    %9 = vector.broadcast %cst_8 : f32 to vector<1x1024xf32>
    %10 = arith.select %7, %9, %4 : vector<1x1024xi1>, vector<1x1024xf32>
    %c25 = arith.constant 25 : index
    %c0_9 = arith.constant 0 : index
    %11 = vector.load %arg2[%c25, %c0_9] : memref<76x1024xf32, #tpu.memory_space<vmem>>, vector<1x1024xf32>
    %12 = arith.select %7, %11, %5 : vector<1x1024xi1>, vector<1x1024xf32>
    %c2_10 = arith.constant 2 : index
    %c0_11 = arith.constant 0 : index
    %13 = vector.load %arg2[%c2_10, %c0_11] : memref<76x1024xf32, #tpu.memory_space<vmem>>, vector<1x1024xf32>
    %14 = arith.cmpf ogt, %13, %8 : vector<1x1024xf32>
    %15 = arith.select %14, %13, %8 : vector<1x1024xi1>, vector<1x1024xf32>
    %cst_12 = arith.constant 2.000000e+00 : f32
    %16 = vector.broadcast %cst_12 : f32 to vector<1x1024xf32>
    %17 = arith.select %14, %16, %10 : vector<1x1024xi1>, vector<1x1024xf32>
    %c26 = arith.constant 26 : index
    %c0_13 = arith.constant 0 : index
    %18 = vector.load %arg2[%c26, %c0_13] : memref<76x1024xf32, #tpu.memory_space<vmem>>, vector<1x1024xf32>
    %19 = arith.select %14, %18, %12 : vector<1x1024xi1>, vector<1x1024xf32>
    %c3 = arith.constant 3 : index
    %c0_14 = arith.constant 0 : index
    %20 = vector.load %arg2[%c3, %c0_14] : memref<76x1024xf32, #tpu.memory_space<vmem>>, vector<1x1024xf32>
    %21 = arith.cmpf ogt, %20, %15 : vector<1x1024xf32>
    %22 = arith.select %21, %20, %15 : vector<1x1024xi1>, vector<1x1024xf32>
    %cst_15 = arith.constant 3.000000e+00 : f32
    %23 = vector.broadcast %cst_15 : f32 to vector<1x1024xf32>
    %24 = arith.select %21, %23, %17 : vector<1x1024xi1>, vector<1x1024xf32>
    %c27 = arith.constant 27 : index
    %c0_16 = arith.constant 0 : index
    %25 = vector.load %arg2[%c27, %c0_16] : memref<76x1024xf32, #tpu.memory_space<vmem>>, vector<1x1024xf32>
    %26 = arith.select %21, %25, %19 : vector<1x1024xi1>, vector<1x1024xf32>
    %c4 = arith.constant 4 : index
    %c0_17 = arith.constant 0 : index
    %27 = vector.load %arg2[%c4, %c0_17] : memref<76x1024xf32, #tpu.memory_space<vmem>>, vector<1x1024xf32>
    %28 = arith.cmpf ogt, %27, %22 : vector<1x1024xf32>
    %29 = arith.select %28, %27, %22 : vector<1x1024xi1>, vector<1x1024xf32>
    %cst_18 = arith.constant 4.000000e+00 : f32
    %30 = vector.broadcast %cst_18 : f32 to vector<1x1024xf32>
    %31 = arith.select %28, %30, %24 : vector<1x1024xi1>, vector<1x1024xf32>
    %c28 = arith.constant 28 : index
    %c0_19 = arith.constant 0 : index
    %32 = vector.load %arg2[%c28, %c0_19] : memref<76x1024xf32, #tpu.memory_space<vmem>>, vector<1x1024xf32>
    %33 = arith.select %28, %32, %26 : vector<1x1024xi1>, vector<1x1024xf32>
    %c5 = arith.constant 5 : index
    %c0_20 = arith.constant 0 : index
    %34 = vector.load %arg2[%c5, %c0_20] : memref<76x1024xf32, #tpu.memory_space<vmem>>, vector<1x1024xf32>
    %35 = arith.cmpf ogt, %34, %29 : vector<1x1024xf32>
    %36 = arith.select %35, %34, %29 : vector<1x1024xi1>, vector<1x1024xf32>
    %cst_21 = arith.constant 5.000000e+00 : f32
    %37 = vector.broadcast %cst_21 : f32 to vector<1x1024xf32>
    %38 = arith.select %35, %37, %31 : vector<1x1024xi1>, vector<1x1024xf32>
    %c29 = arith.constant 29 : index
    %c0_22 = arith.constant 0 : index
    %39 = vector.load %arg2[%c29, %c0_22] : memref<76x1024xf32, #tpu.memory_space<vmem>>, vector<1x1024xf32>
    %40 = arith.select %35, %39, %33 : vector<1x1024xi1>, vector<1x1024xf32>
    %c6 = arith.constant 6 : index
    %c0_23 = arith.constant 0 : index
    %41 = vector.load %arg2[%c6, %c0_23] : memref<76x1024xf32, #tpu.memory_space<vmem>>, vector<1x1024xf32>
    %42 = arith.cmpf ogt, %41, %36 : vector<1x1024xf32>
    %43 = arith.select %42, %41, %36 : vector<1x1024xi1>, vector<1x1024xf32>
    %cst_24 = arith.constant 6.000000e+00 : f32
    %44 = vector.broadcast %cst_24 : f32 to vector<1x1024xf32>
    %45 = arith.select %42, %44, %38 : vector<1x1024xi1>, vector<1x1024xf32>
    %c30 = arith.constant 30 : index
    %c0_25 = arith.constant 0 : index
    %46 = vector.load %arg2[%c30, %c0_25] : memref<76x1024xf32, #tpu.memory_space<vmem>>, vector<1x1024xf32>
    %47 = arith.select %42, %46, %40 : vector<1x1024xi1>, vector<1x1024xf32>
    %c7 = arith.constant 7 : index
    %c0_26 = arith.constant 0 : index
    %48 = vector.load %arg2[%c7, %c0_26] : memref<76x1024xf32, #tpu.memory_space<vmem>>, vector<1x1024xf32>
    %49 = arith.cmpf ogt, %48, %43 : vector<1x1024xf32>
    %50 = arith.select %49, %48, %43 : vector<1x1024xi1>, vector<1x1024xf32>
    %cst_27 = arith.constant 7.000000e+00 : f32
    %51 = vector.broadcast %cst_27 : f32 to vector<1x1024xf32>
    %52 = arith.select %49, %51, %45 : vector<1x1024xi1>, vector<1x1024xf32>
    %c31 = arith.constant 31 : index
    %c0_28 = arith.constant 0 : index
    %53 = vector.load %arg2[%c31, %c0_28] : memref<76x1024xf32, #tpu.memory_space<vmem>>, vector<1x1024xf32>
    %54 = arith.select %49, %53, %47 : vector<1x1024xi1>, vector<1x1024xf32>
    %c8 = arith.constant 8 : index
    %c0_29 = arith.constant 0 : index
    %55 = vector.load %arg2[%c8, %c0_29] : memref<76x1024xf32, #tpu.memory_space<vmem>>, vector<1x1024xf32>
    %56 = arith.cmpf ogt, %55, %50 : vector<1x1024xf32>
    %57 = arith.select %56, %55, %50 : vector<1x1024xi1>, vector<1x1024xf32>
    %cst_30 = arith.constant 8.000000e+00 : f32
    %58 = vector.broadcast %cst_30 : f32 to vector<1x1024xf32>
    %59 = arith.select %56, %58, %52 : vector<1x1024xi1>, vector<1x1024xf32>
    %c32 = arith.constant 32 : index
    %c0_31 = arith.constant 0 : index
    %60 = vector.load %arg2[%c32, %c0_31] : memref<76x1024xf32, #tpu.memory_space<vmem>>, vector<1x1024xf32>
    %61 = arith.select %56, %60, %54 : vector<1x1024xi1>, vector<1x1024xf32>
    %c9 = arith.constant 9 : index
    %c0_32 = arith.constant 0 : index
    %62 = vector.load %arg2[%c9, %c0_32] : memref<76x1024xf32, #tpu.memory_space<vmem>>, vector<1x1024xf32>
    %63 = arith.cmpf ogt, %62, %57 : vector<1x1024xf32>
    %64 = arith.select %63, %62, %57 : vector<1x1024xi1>, vector<1x1024xf32>
    %cst_33 = arith.constant 9.000000e+00 : f32
    %65 = vector.broadcast %cst_33 : f32 to vector<1x1024xf32>
    %66 = arith.select %63, %65, %59 : vector<1x1024xi1>, vector<1x1024xf32>
    %c33 = arith.constant 33 : index
    %c0_34 = arith.constant 0 : index
    %67 = vector.load %arg2[%c33, %c0_34] : memref<76x1024xf32, #tpu.memory_space<vmem>>, vector<1x1024xf32>
    %68 = arith.select %63, %67, %61 : vector<1x1024xi1>, vector<1x1024xf32>
    %c10 = arith.constant 10 : index
    %c0_35 = arith.constant 0 : index
    %69 = vector.load %arg2[%c10, %c0_35] : memref<76x1024xf32, #tpu.memory_space<vmem>>, vector<1x1024xf32>
    %70 = arith.cmpf ogt, %69, %64 : vector<1x1024xf32>
    %71 = arith.select %70, %69, %64 : vector<1x1024xi1>, vector<1x1024xf32>
    %cst_36 = arith.constant 1.000000e+01 : f32
    %72 = vector.broadcast %cst_36 : f32 to vector<1x1024xf32>
    %73 = arith.select %70, %72, %66 : vector<1x1024xi1>, vector<1x1024xf32>
    %c34 = arith.constant 34 : index
    %c0_37 = arith.constant 0 : index
    %74 = vector.load %arg2[%c34, %c0_37] : memref<76x1024xf32, #tpu.memory_space<vmem>>, vector<1x1024xf32>
    %75 = arith.select %70, %74, %68 : vector<1x1024xi1>, vector<1x1024xf32>
    %c11 = arith.constant 11 : index
    %c0_38 = arith.constant 0 : index
    %76 = vector.load %arg2[%c11, %c0_38] : memref<76x1024xf32, #tpu.memory_space<vmem>>, vector<1x1024xf32>
    %77 = arith.cmpf ogt, %76, %71 : vector<1x1024xf32>
    %cst_39 = arith.constant 1.100000e+01 : f32
    %78 = vector.broadcast %cst_39 : f32 to vector<1x1024xf32>
    %79 = arith.select %77, %78, %73 : vector<1x1024xi1>, vector<1x1024xf32>
    %c35 = arith.constant 35 : index
    %c0_40 = arith.constant 0 : index
    %80 = vector.load %arg2[%c35, %c0_40] : memref<76x1024xf32, #tpu.memory_space<vmem>>, vector<1x1024xf32>
    %81 = arith.select %77, %80, %75 : vector<1x1024xi1>, vector<1x1024xf32>
    %c12 = arith.constant 12 : index
    %c0_41 = arith.constant 0 : index
    %82 = vector.load %arg2[%c12, %c0_41] : memref<76x1024xf32, #tpu.memory_space<vmem>>, vector<1x1024xf32>
    %cst_42 = arith.constant 0.000000e+00 : f32
    %83 = vector.broadcast %cst_42 : f32 to vector<1x1024xf32>
    %c36 = arith.constant 36 : index
    %c0_43 = arith.constant 0 : index
    %84 = vector.load %arg2[%c36, %c0_43] : memref<76x1024xf32, #tpu.memory_space<vmem>>, vector<1x1024xf32>
    %c13 = arith.constant 13 : index
    %c0_44 = arith.constant 0 : index
    %85 = vector.load %arg2[%c13, %c0_44] : memref<76x1024xf32, #tpu.memory_space<vmem>>, vector<1x1024xf32>
    %86 = arith.cmpf ogt, %85, %82 : vector<1x1024xf32>
    %87 = arith.select %86, %85, %82 : vector<1x1024xi1>, vector<1x1024xf32>
    %cst_45 = arith.constant 1.000000e+00 : f32
    %88 = vector.broadcast %cst_45 : f32 to vector<1x1024xf32>
    %89 = arith.select %86, %88, %83 : vector<1x1024xi1>, vector<1x1024xf32>
    %c37 = arith.constant 37 : index
    %c0_46 = arith.constant 0 : index
    %90 = vector.load %arg2[%c37, %c0_46] : memref<76x1024xf32, #tpu.memory_space<vmem>>, vector<1x1024xf32>
    %91 = arith.select %86, %90, %84 : vector<1x1024xi1>, vector<1x1024xf32>
    %c14 = arith.constant 14 : index
    %c0_47 = arith.constant 0 : index
    %92 = vector.load %arg2[%c14, %c0_47] : memref<76x1024xf32, #tpu.memory_space<vmem>>, vector<1x1024xf32>
    %93 = arith.cmpf ogt, %92, %87 : vector<1x1024xf32>
    %94 = arith.select %93, %92, %87 : vector<1x1024xi1>, vector<1x1024xf32>
    %cst_48 = arith.constant 2.000000e+00 : f32
    %95 = vector.broadcast %cst_48 : f32 to vector<1x1024xf32>
    %96 = arith.select %93, %95, %89 : vector<1x1024xi1>, vector<1x1024xf32>
    %c38 = arith.constant 38 : index
    %c0_49 = arith.constant 0 : index
    %97 = vector.load %arg2[%c38, %c0_49] : memref<76x1024xf32, #tpu.memory_space<vmem>>, vector<1x1024xf32>
    %98 = arith.select %93, %97, %91 : vector<1x1024xi1>, vector<1x1024xf32>
    %c15 = arith.constant 15 : index
    %c0_50 = arith.constant 0 : index
    %99 = vector.load %arg2[%c15, %c0_50] : memref<76x1024xf32, #tpu.memory_space<vmem>>, vector<1x1024xf32>
    %100 = arith.cmpf ogt, %99, %94 : vector<1x1024xf32>
    %101 = arith.select %100, %99, %94 : vector<1x1024xi1>, vector<1x1024xf32>
    %cst_51 = arith.constant 3.000000e+00 : f32
    %102 = vector.broadcast %cst_51 : f32 to vector<1x1024xf32>
    %103 = arith.select %100, %102, %96 : vector<1x1024xi1>, vector<1x1024xf32>
    %c39 = arith.constant 39 : index
    %c0_52 = arith.constant 0 : index
    %104 = vector.load %arg2[%c39, %c0_52] : memref<76x1024xf32, #tpu.memory_space<vmem>>, vector<1x1024xf32>
    %105 = arith.select %100, %104, %98 : vector<1x1024xi1>, vector<1x1024xf32>
    %c16 = arith.constant 16 : index
    %c0_53 = arith.constant 0 : index
    %106 = vector.load %arg2[%c16, %c0_53] : memref<76x1024xf32, #tpu.memory_space<vmem>>, vector<1x1024xf32>
    %107 = arith.cmpf ogt, %106, %101 : vector<1x1024xf32>
    %108 = arith.select %107, %106, %101 : vector<1x1024xi1>, vector<1x1024xf32>
    %cst_54 = arith.constant 4.000000e+00 : f32
    %109 = vector.broadcast %cst_54 : f32 to vector<1x1024xf32>
    %110 = arith.select %107, %109, %103 : vector<1x1024xi1>, vector<1x1024xf32>
    %c40 = arith.constant 40 : index
    %c0_55 = arith.constant 0 : index
    %111 = vector.load %arg2[%c40, %c0_55] : memref<76x1024xf32, #tpu.memory_space<vmem>>, vector<1x1024xf32>
    %112 = arith.select %107, %111, %105 : vector<1x1024xi1>, vector<1x1024xf32>
    %c17 = arith.constant 17 : index
    %c0_56 = arith.constant 0 : index
    %113 = vector.load %arg2[%c17, %c0_56] : memref<76x1024xf32, #tpu.memory_space<vmem>>, vector<1x1024xf32>
    %114 = arith.cmpf ogt, %113, %108 : vector<1x1024xf32>
    %115 = arith.select %114, %113, %108 : vector<1x1024xi1>, vector<1x1024xf32>
    %cst_57 = arith.constant 5.000000e+00 : f32
    %116 = vector.broadcast %cst_57 : f32 to vector<1x1024xf32>
    %117 = arith.select %114, %116, %110 : vector<1x1024xi1>, vector<1x1024xf32>
    %c41 = arith.constant 41 : index
    %c0_58 = arith.constant 0 : index
    %118 = vector.load %arg2[%c41, %c0_58] : memref<76x1024xf32, #tpu.memory_space<vmem>>, vector<1x1024xf32>
    %119 = arith.select %114, %118, %112 : vector<1x1024xi1>, vector<1x1024xf32>
    %c18 = arith.constant 18 : index
    %c0_59 = arith.constant 0 : index
    %120 = vector.load %arg2[%c18, %c0_59] : memref<76x1024xf32, #tpu.memory_space<vmem>>, vector<1x1024xf32>
    %121 = arith.cmpf ogt, %120, %115 : vector<1x1024xf32>
    %122 = arith.select %121, %120, %115 : vector<1x1024xi1>, vector<1x1024xf32>
    %cst_60 = arith.constant 6.000000e+00 : f32
    %123 = vector.broadcast %cst_60 : f32 to vector<1x1024xf32>
    %124 = arith.select %121, %123, %117 : vector<1x1024xi1>, vector<1x1024xf32>
    %c42 = arith.constant 42 : index
    %c0_61 = arith.constant 0 : index
    %125 = vector.load %arg2[%c42, %c0_61] : memref<76x1024xf32, #tpu.memory_space<vmem>>, vector<1x1024xf32>
    %126 = arith.select %121, %125, %119 : vector<1x1024xi1>, vector<1x1024xf32>
    %c19 = arith.constant 19 : index
    %c0_62 = arith.constant 0 : index
    %127 = vector.load %arg2[%c19, %c0_62] : memref<76x1024xf32, #tpu.memory_space<vmem>>, vector<1x1024xf32>
    %128 = arith.cmpf ogt, %127, %122 : vector<1x1024xf32>
    %129 = arith.select %128, %127, %122 : vector<1x1024xi1>, vector<1x1024xf32>
    %cst_63 = arith.constant 7.000000e+00 : f32
    %130 = vector.broadcast %cst_63 : f32 to vector<1x1024xf32>
    %131 = arith.select %128, %130, %124 : vector<1x1024xi1>, vector<1x1024xf32>
    %c43 = arith.constant 43 : index
    %c0_64 = arith.constant 0 : index
    %132 = vector.load %arg2[%c43, %c0_64] : memref<76x1024xf32, #tpu.memory_space<vmem>>, vector<1x1024xf32>
    %133 = arith.select %128, %132, %126 : vector<1x1024xi1>, vector<1x1024xf32>
    %c20 = arith.constant 20 : index
    %c0_65 = arith.constant 0 : index
    %134 = vector.load %arg2[%c20, %c0_65] : memref<76x1024xf32, #tpu.memory_space<vmem>>, vector<1x1024xf32>
    %135 = arith.cmpf ogt, %134, %129 : vector<1x1024xf32>
    %136 = arith.select %135, %134, %129 : vector<1x1024xi1>, vector<1x1024xf32>
    %cst_66 = arith.constant 8.000000e+00 : f32
    %137 = vector.broadcast %cst_66 : f32 to vector<1x1024xf32>
    %138 = arith.select %135, %137, %131 : vector<1x1024xi1>, vector<1x1024xf32>
    %c44 = arith.constant 44 : index
    %c0_67 = arith.constant 0 : index
    %139 = vector.load %arg2[%c44, %c0_67] : memref<76x1024xf32, #tpu.memory_space<vmem>>, vector<1x1024xf32>
    %140 = arith.select %135, %139, %133 : vector<1x1024xi1>, vector<1x1024xf32>
    %c21 = arith.constant 21 : index
    %c0_68 = arith.constant 0 : index
    %141 = vector.load %arg2[%c21, %c0_68] : memref<76x1024xf32, #tpu.memory_space<vmem>>, vector<1x1024xf32>
    %142 = arith.cmpf ogt, %141, %136 : vector<1x1024xf32>
    %143 = arith.select %142, %141, %136 : vector<1x1024xi1>, vector<1x1024xf32>
    %cst_69 = arith.constant 9.000000e+00 : f32
    %144 = vector.broadcast %cst_69 : f32 to vector<1x1024xf32>
    %145 = arith.select %142, %144, %138 : vector<1x1024xi1>, vector<1x1024xf32>
    %c45 = arith.constant 45 : index
    %c0_70 = arith.constant 0 : index
    %146 = vector.load %arg2[%c45, %c0_70] : memref<76x1024xf32, #tpu.memory_space<vmem>>, vector<1x1024xf32>
    %147 = arith.select %142, %146, %140 : vector<1x1024xi1>, vector<1x1024xf32>
    %c22 = arith.constant 22 : index
    %c0_71 = arith.constant 0 : index
    %148 = vector.load %arg2[%c22, %c0_71] : memref<76x1024xf32, #tpu.memory_space<vmem>>, vector<1x1024xf32>
    %149 = arith.cmpf ogt, %148, %143 : vector<1x1024xf32>
    %150 = arith.select %149, %148, %143 : vector<1x1024xi1>, vector<1x1024xf32>
    %cst_72 = arith.constant 1.000000e+01 : f32
    %151 = vector.broadcast %cst_72 : f32 to vector<1x1024xf32>
    %152 = arith.select %149, %151, %145 : vector<1x1024xi1>, vector<1x1024xf32>
    %c46 = arith.constant 46 : index
    %c0_73 = arith.constant 0 : index
    %153 = vector.load %arg2[%c46, %c0_73] : memref<76x1024xf32, #tpu.memory_space<vmem>>, vector<1x1024xf32>
    %154 = arith.select %149, %153, %147 : vector<1x1024xi1>, vector<1x1024xf32>
    %c23 = arith.constant 23 : index
    %c0_74 = arith.constant 0 : index
    %155 = vector.load %arg2[%c23, %c0_74] : memref<76x1024xf32, #tpu.memory_space<vmem>>, vector<1x1024xf32>
    %156 = arith.cmpf ogt, %155, %150 : vector<1x1024xf32>
    %cst_75 = arith.constant 1.100000e+01 : f32
    %157 = vector.broadcast %cst_75 : f32 to vector<1x1024xf32>
    %158 = arith.select %156, %157, %152 : vector<1x1024xi1>, vector<1x1024xf32>
    %c47 = arith.constant 47 : index
    %c0_76 = arith.constant 0 : index
    %159 = vector.load %arg2[%c47, %c0_76] : memref<76x1024xf32, #tpu.memory_space<vmem>>, vector<1x1024xf32>
    %160 = arith.select %156, %159, %154 : vector<1x1024xi1>, vector<1x1024xf32>
    %cst_77 = arith.constant 5.000000e-01 : f32
    %161 = vector.broadcast %cst_77 : f32 to vector<1x1024xf32>
    %162 = arith.addf %79, %161 : vector<1x1024xf32>
    %163 = arith.addf %162, %81 : vector<1x1024xf32>
    %cst_78 = arith.constant 5.000000e-01 : f32
    %164 = vector.broadcast %cst_78 : f32 to vector<1x1024xf32>
    %165 = arith.mulf %163, %164 : vector<1x1024xf32>
    %cst_79 = arith.constant 3.000000e+00 : f32
    %166 = vector.broadcast %cst_79 : f32 to vector<1x1024xf32>
    %167 = arith.subf %165, %166 : vector<1x1024xf32>
    %168 = arith.addf %167, %0 : vector<1x1024xf32>
    %cst_80 = arith.constant 5.000000e-01 : f32
    %169 = vector.broadcast %cst_80 : f32 to vector<1x1024xf32>
    %170 = arith.addf %158, %169 : vector<1x1024xf32>
    %171 = arith.addf %170, %160 : vector<1x1024xf32>
    %cst_81 = arith.constant 5.000000e-01 : f32
    %172 = vector.broadcast %cst_81 : f32 to vector<1x1024xf32>
    %173 = arith.mulf %171, %172 : vector<1x1024xf32>
    %cst_82 = arith.constant 3.000000e+00 : f32
    %174 = vector.broadcast %cst_82 : f32 to vector<1x1024xf32>
    %175 = arith.subf %173, %174 : vector<1x1024xf32>
    %176 = arith.addf %175, %2 : vector<1x1024xf32>
    %c48 = arith.constant 48 : index
    %c0_83 = arith.constant 0 : index
    %177 = vector.load %arg2[%c48, %c0_83] : memref<76x1024xf32, #tpu.memory_space<vmem>>, vector<1x1024xf32>
    %178 = arith.addf %1, %177 : vector<1x1024xf32>
    %c49 = arith.constant 49 : index
    %c0_84 = arith.constant 0 : index
    %179 = vector.load %arg2[%c49, %c0_84] : memref<76x1024xf32, #tpu.memory_space<vmem>>, vector<1x1024xf32>
    %cst_85 = arith.constant 0.000000e+00 : f32
    %180 = vector.broadcast %cst_85 : f32 to vector<1x1024xf32>
    %c61 = arith.constant 61 : index
    %c0_86 = arith.constant 0 : index
    %181 = vector.load %arg2[%c61, %c0_86] : memref<76x1024xf32, #tpu.memory_space<vmem>>, vector<1x1024xf32>
    %c50 = arith.constant 50 : index
    %c0_87 = arith.constant 0 : index
    %182 = vector.load %arg2[%c50, %c0_87] : memref<76x1024xf32, #tpu.memory_space<vmem>>, vector<1x1024xf32>
    %183 = arith.cmpf ogt, %182, %179 : vector<1x1024xf32>
    %184 = arith.select %183, %182, %179 : vector<1x1024xi1>, vector<1x1024xf32>
    %cst_88 = arith.constant 1.000000e+00 : f32
    %185 = vector.broadcast %cst_88 : f32 to vector<1x1024xf32>
    %186 = arith.select %183, %185, %180 : vector<1x1024xi1>, vector<1x1024xf32>
    %c62 = arith.constant 62 : index
    %c0_89 = arith.constant 0 : index
    %187 = vector.load %arg2[%c62, %c0_89] : memref<76x1024xf32, #tpu.memory_space<vmem>>, vector<1x1024xf32>
    %188 = arith.select %183, %187, %181 : vector<1x1024xi1>, vector<1x1024xf32>
    %c51 = arith.constant 51 : index
    %c0_90 = arith.constant 0 : index
    %189 = vector.load %arg2[%c51, %c0_90] : memref<76x1024xf32, #tpu.memory_space<vmem>>, vector<1x1024xf32>
    %190 = arith.cmpf ogt, %189, %184 : vector<1x1024xf32>
    %191 = arith.select %190, %189, %184 : vector<1x1024xi1>, vector<1x1024xf32>
    %cst_91 = arith.constant 2.000000e+00 : f32
    %192 = vector.broadcast %cst_91 : f32 to vector<1x1024xf32>
    %193 = arith.select %190, %192, %186 : vector<1x1024xi1>, vector<1x1024xf32>
    %c63 = arith.constant 63 : index
    %c0_92 = arith.constant 0 : index
    %194 = vector.load %arg2[%c63, %c0_92] : memref<76x1024xf32, #tpu.memory_space<vmem>>, vector<1x1024xf32>
    %195 = arith.select %190, %194, %188 : vector<1x1024xi1>, vector<1x1024xf32>
    %c52 = arith.constant 52 : index
    %c0_93 = arith.constant 0 : index
    %196 = vector.load %arg2[%c52, %c0_93] : memref<76x1024xf32, #tpu.memory_space<vmem>>, vector<1x1024xf32>
    %197 = arith.cmpf ogt, %196, %191 : vector<1x1024xf32>
    %198 = arith.select %197, %196, %191 : vector<1x1024xi1>, vector<1x1024xf32>
    %cst_94 = arith.constant 3.000000e+00 : f32
    %199 = vector.broadcast %cst_94 : f32 to vector<1x1024xf32>
    %200 = arith.select %197, %199, %193 : vector<1x1024xi1>, vector<1x1024xf32>
    %c64 = arith.constant 64 : index
    %c0_95 = arith.constant 0 : index
    %201 = vector.load %arg2[%c64, %c0_95] : memref<76x1024xf32, #tpu.memory_space<vmem>>, vector<1x1024xf32>
    %202 = arith.select %197, %201, %195 : vector<1x1024xi1>, vector<1x1024xf32>
    %c53 = arith.constant 53 : index
    %c0_96 = arith.constant 0 : index
    %203 = vector.load %arg2[%c53, %c0_96] : memref<76x1024xf32, #tpu.memory_space<vmem>>, vector<1x1024xf32>
    %204 = arith.cmpf ogt, %203, %198 : vector<1x1024xf32>
    %205 = arith.select %204, %203, %198 : vector<1x1024xi1>, vector<1x1024xf32>
    %cst_97 = arith.constant 4.000000e+00 : f32
    %206 = vector.broadcast %cst_97 : f32 to vector<1x1024xf32>
    %207 = arith.select %204, %206, %200 : vector<1x1024xi1>, vector<1x1024xf32>
    %c65 = arith.constant 65 : index
    %c0_98 = arith.constant 0 : index
    %208 = vector.load %arg2[%c65, %c0_98] : memref<76x1024xf32, #tpu.memory_space<vmem>>, vector<1x1024xf32>
    %209 = arith.select %204, %208, %202 : vector<1x1024xi1>, vector<1x1024xf32>
    %c54 = arith.constant 54 : index
    %c0_99 = arith.constant 0 : index
    %210 = vector.load %arg2[%c54, %c0_99] : memref<76x1024xf32, #tpu.memory_space<vmem>>, vector<1x1024xf32>
    %211 = arith.cmpf ogt, %210, %205 : vector<1x1024xf32>
    %212 = arith.select %211, %210, %205 : vector<1x1024xi1>, vector<1x1024xf32>
    %cst_100 = arith.constant 5.000000e+00 : f32
    %213 = vector.broadcast %cst_100 : f32 to vector<1x1024xf32>
    %214 = arith.select %211, %213, %207 : vector<1x1024xi1>, vector<1x1024xf32>
    %c66 = arith.constant 66 : index
    %c0_101 = arith.constant 0 : index
    %215 = vector.load %arg2[%c66, %c0_101] : memref<76x1024xf32, #tpu.memory_space<vmem>>, vector<1x1024xf32>
    %216 = arith.select %211, %215, %209 : vector<1x1024xi1>, vector<1x1024xf32>
    %c55 = arith.constant 55 : index
    %c0_102 = arith.constant 0 : index
    %217 = vector.load %arg2[%c55, %c0_102] : memref<76x1024xf32, #tpu.memory_space<vmem>>, vector<1x1024xf32>
    %218 = arith.cmpf ogt, %217, %212 : vector<1x1024xf32>
    %219 = arith.select %218, %217, %212 : vector<1x1024xi1>, vector<1x1024xf32>
    %cst_103 = arith.constant 6.000000e+00 : f32
    %220 = vector.broadcast %cst_103 : f32 to vector<1x1024xf32>
    %221 = arith.select %218, %220, %214 : vector<1x1024xi1>, vector<1x1024xf32>
    %c67 = arith.constant 67 : index
    %c0_104 = arith.constant 0 : index
    %222 = vector.load %arg2[%c67, %c0_104] : memref<76x1024xf32, #tpu.memory_space<vmem>>, vector<1x1024xf32>
    %223 = arith.select %218, %222, %216 : vector<1x1024xi1>, vector<1x1024xf32>
    %c56 = arith.constant 56 : index
    %c0_105 = arith.constant 0 : index
    %224 = vector.load %arg2[%c56, %c0_105] : memref<76x1024xf32, #tpu.memory_space<vmem>>, vector<1x1024xf32>
    %225 = arith.cmpf ogt, %224, %219 : vector<1x1024xf32>
    %226 = arith.select %225, %224, %219 : vector<1x1024xi1>, vector<1x1024xf32>
    %cst_106 = arith.constant 7.000000e+00 : f32
    %227 = vector.broadcast %cst_106 : f32 to vector<1x1024xf32>
    %228 = arith.select %225, %227, %221 : vector<1x1024xi1>, vector<1x1024xf32>
    %c68 = arith.constant 68 : index
    %c0_107 = arith.constant 0 : index
    %229 = vector.load %arg2[%c68, %c0_107] : memref<76x1024xf32, #tpu.memory_space<vmem>>, vector<1x1024xf32>
    %230 = arith.select %225, %229, %223 : vector<1x1024xi1>, vector<1x1024xf32>
    %c57 = arith.constant 57 : index
    %c0_108 = arith.constant 0 : index
    %231 = vector.load %arg2[%c57, %c0_108] : memref<76x1024xf32, #tpu.memory_space<vmem>>, vector<1x1024xf32>
    %232 = arith.cmpf ogt, %231, %226 : vector<1x1024xf32>
    %233 = arith.select %232, %231, %226 : vector<1x1024xi1>, vector<1x1024xf32>
    %cst_109 = arith.constant 8.000000e+00 : f32
    %234 = vector.broadcast %cst_109 : f32 to vector<1x1024xf32>
    %235 = arith.select %232, %234, %228 : vector<1x1024xi1>, vector<1x1024xf32>
    %c69 = arith.constant 69 : index
    %c0_110 = arith.constant 0 : index
    %236 = vector.load %arg2[%c69, %c0_110] : memref<76x1024xf32, #tpu.memory_space<vmem>>, vector<1x1024xf32>
    %237 = arith.select %232, %236, %230 : vector<1x1024xi1>, vector<1x1024xf32>
    %c58 = arith.constant 58 : index
    %c0_111 = arith.constant 0 : index
    %238 = vector.load %arg2[%c58, %c0_111] : memref<76x1024xf32, #tpu.memory_space<vmem>>, vector<1x1024xf32>
    %239 = arith.cmpf ogt, %238, %233 : vector<1x1024xf32>
    %240 = arith.select %239, %238, %233 : vector<1x1024xi1>, vector<1x1024xf32>
    %cst_112 = arith.constant 9.000000e+00 : f32
    %241 = vector.broadcast %cst_112 : f32 to vector<1x1024xf32>
    %242 = arith.select %239, %241, %235 : vector<1x1024xi1>, vector<1x1024xf32>
    %c70 = arith.constant 70 : index
    %c0_113 = arith.constant 0 : index
    %243 = vector.load %arg2[%c70, %c0_113] : memref<76x1024xf32, #tpu.memory_space<vmem>>, vector<1x1024xf32>
    %244 = arith.select %239, %243, %237 : vector<1x1024xi1>, vector<1x1024xf32>
    %c59 = arith.constant 59 : index
    %c0_114 = arith.constant 0 : index
    %245 = vector.load %arg2[%c59, %c0_114] : memref<76x1024xf32, #tpu.memory_space<vmem>>, vector<1x1024xf32>
    %246 = arith.cmpf ogt, %245, %240 : vector<1x1024xf32>
    %247 = arith.select %246, %245, %240 : vector<1x1024xi1>, vector<1x1024xf32>
    %cst_115 = arith.constant 1.000000e+01 : f32
    %248 = vector.broadcast %cst_115 : f32 to vector<1x1024xf32>
    %249 = arith.select %246, %248, %242 : vector<1x1024xi1>, vector<1x1024xf32>
    %c71 = arith.constant 71 : index
    %c0_116 = arith.constant 0 : index
    %250 = vector.load %arg2[%c71, %c0_116] : memref<76x1024xf32, #tpu.memory_space<vmem>>, vector<1x1024xf32>
    %251 = arith.select %246, %250, %244 : vector<1x1024xi1>, vector<1x1024xf32>
    %c60 = arith.constant 60 : index
    %c0_117 = arith.constant 0 : index
    %252 = vector.load %arg2[%c60, %c0_117] : memref<76x1024xf32, #tpu.memory_space<vmem>>, vector<1x1024xf32>
    %253 = arith.cmpf ogt, %252, %247 : vector<1x1024xf32>
    %cst_118 = arith.constant 1.100000e+01 : f32
    %254 = vector.broadcast %cst_118 : f32 to vector<1x1024xf32>
    %255 = arith.select %253, %254, %249 : vector<1x1024xi1>, vector<1x1024xf32>
    %c72 = arith.constant 72 : index
    %c0_119 = arith.constant 0 : index
    %256 = vector.load %arg2[%c72, %c0_119] : memref<76x1024xf32, #tpu.memory_space<vmem>>, vector<1x1024xf32>
    %257 = arith.select %253, %256, %251 : vector<1x1024xi1>, vector<1x1024xf32>
    %cst_120 = arith.constant 0.52359879 : f32
    %258 = vector.broadcast %cst_120 : f32 to vector<1x1024xf32>
    %259 = arith.mulf %255, %258 : vector<1x1024xf32>
    %cst_121 = arith.constant 0.261799395 : f32
    %260 = vector.broadcast %cst_121 : f32 to vector<1x1024xf32>
    %261 = arith.mulf %257, %260 : vector<1x1024xf32>
    %262 = arith.addf %259, %261 : vector<1x1024xf32>
    %cst_122 = arith.constant 6.28318548 : f32
    %263 = vector.broadcast %cst_122 : f32 to vector<1x1024xf32>
    %264 = arith.remf %262, %263 : vector<1x1024xf32>
    %cst_123 = arith.constant 0.000000e+00 : f32
    %265 = vector.broadcast %cst_123 : f32 to vector<1x1024xf32>
    %266 = arith.cmpf one, %264, %265 : vector<1x1024xf32>
    %cst_124 = arith.constant 0.000000e+00 : f32
    %267 = vector.broadcast %cst_124 : f32 to vector<1x1024xf32>
    %268 = arith.cmpf olt, %264, %267 : vector<1x1024xf32>
    %cst_125 = arith.constant 0.000000e+00 : f32
    %269 = arith.cmpf olt, %cst_122, %cst_125 : f32
    %270 = vector.broadcast %269 : i1 to vector<1x1024xi1>
    %271 = vector.broadcast %270 : vector<1x1024xi1> to vector<1x1024xi1>
    %272 = arith.xori %268, %271 : vector<1x1024xi1>
    %273 = arith.andi %272, %266 : vector<1x1024xi1>
    %274 = vector.broadcast %cst_122 : f32 to vector<1x1024xf32>
    %275 = arith.addf %264, %274 : vector<1x1024xf32>
    %276 = arith.select %273, %275, %264 : vector<1x1024xi1>, vector<1x1024xf32>
    %cst_126 = arith.constant 3.14159274 : f32
    %277 = vector.broadcast %cst_126 : f32 to vector<1x1024xf32>
    %278 = arith.cmpf ogt, %276, %277 : vector<1x1024xf32>
    %cst_127 = arith.constant 6.28318548 : f32
    %279 = vector.broadcast %cst_127 : f32 to vector<1x1024xf32>
    %280 = arith.subf %276, %279 : vector<1x1024xf32>
    %281 = arith.select %278, %280, %276 : vector<1x1024xi1>, vector<1x1024xf32>
    %c73 = arith.constant 73 : index
    %c0_128 = arith.constant 0 : index
    %282 = vector.load %arg2[%c73, %c0_128] : memref<76x1024xf32, #tpu.memory_space<vmem>>, vector<1x1024xf32>
    %cst_129 = arith.constant 1.000000e+00 : f32
    %283 = vector.broadcast %cst_129 : f32 to vector<1x1024xf32>
    %284 = arith.mulf %282, %283 : vector<1x1024xf32>
    %cst_130 = arith.constant 1.000000e+00 : f32
    %285 = vector.broadcast %cst_130 : f32 to vector<1x1024xf32>
    %286 = arith.addf %284, %285 : vector<1x1024xf32>
    %c74 = arith.constant 74 : index
    %c0_131 = arith.constant 0 : index
    %287 = vector.load %arg2[%c74, %c0_131] : memref<76x1024xf32, #tpu.memory_space<vmem>>, vector<1x1024xf32>
    %cst_132 = arith.constant 1.000000e+00 : f32
    %288 = vector.broadcast %cst_132 : f32 to vector<1x1024xf32>
    %289 = arith.mulf %287, %288 : vector<1x1024xf32>
    %cst_133 = arith.constant 1.000000e+00 : f32
    %290 = vector.broadcast %cst_133 : f32 to vector<1x1024xf32>
    %291 = arith.addf %289, %290 : vector<1x1024xf32>
    %c75 = arith.constant 75 : index
    %c0_134 = arith.constant 0 : index
    %292 = vector.load %arg2[%c75, %c0_134] : memref<76x1024xf32, #tpu.memory_space<vmem>>, vector<1x1024xf32>
    %cst_135 = arith.constant 1.000000e+00 : f32
    %293 = vector.broadcast %cst_135 : f32 to vector<1x1024xf32>
    %294 = arith.mulf %292, %293 : vector<1x1024xf32>
    %cst_136 = arith.constant 1.000000e+00 : f32
    %295 = vector.broadcast %cst_136 : f32 to vector<1x1024xf32>
    %296 = arith.addf %294, %295 : vector<1x1024xf32>
    %cst_137 = arith.constant 5.000000e-01 : f32
    %297 = vector.broadcast %cst_137 : f32 to vector<1x1024xf32>
    %298 = arith.mulf %286, %297 : vector<1x1024xf32>
    %299 = arith.addf %178, %298 : vector<1x1024xf32>
    %c0_138 = arith.constant 0 : index
    %c0_139 = arith.constant 0 : index
    %300 = vector.load %arg3[%c0_138, %c0_139] : memref<8x1024xf32, #tpu.memory_space<vmem>>, vector<1x1024xf32>
    tpu.vector_store %arg3[%c0_138, %c0_139], %168 {strides = array<i32>} : memref<8x1024xf32, #tpu.memory_space<vmem>>, vector<1x1024xf32>,
    %c1_140 = arith.constant 1 : index
    %c0_141 = arith.constant 0 : index
    %301 = vector.load %arg3[%c1_140, %c0_141] : memref<8x1024xf32, #tpu.memory_space<vmem>>, vector<1x1024xf32>
    tpu.vector_store %arg3[%c1_140, %c0_141], %299 {strides = array<i32>} : memref<8x1024xf32, #tpu.memory_space<vmem>>, vector<1x1024xf32>,
    %c2_142 = arith.constant 2 : index
    %c0_143 = arith.constant 0 : index
    %302 = vector.load %arg3[%c2_142, %c0_143] : memref<8x1024xf32, #tpu.memory_space<vmem>>, vector<1x1024xf32>
    tpu.vector_store %arg3[%c2_142, %c0_143], %176 {strides = array<i32>} : memref<8x1024xf32, #tpu.memory_space<vmem>>, vector<1x1024xf32>,
    %c3_144 = arith.constant 3 : index
    %c0_145 = arith.constant 0 : index
    %303 = vector.load %arg3[%c3_144, %c0_145] : memref<8x1024xf32, #tpu.memory_space<vmem>>, vector<1x1024xf32>
    tpu.vector_store %arg3[%c3_144, %c0_145], %286 {strides = array<i32>} : memref<8x1024xf32, #tpu.memory_space<vmem>>, vector<1x1024xf32>,
    %c4_146 = arith.constant 4 : index
    %c0_147 = arith.constant 0 : index
    %304 = vector.load %arg3[%c4_146, %c0_147] : memref<8x1024xf32, #tpu.memory_space<vmem>>, vector<1x1024xf32>
    tpu.vector_store %arg3[%c4_146, %c0_147], %291 {strides = array<i32>} : memref<8x1024xf32, #tpu.memory_space<vmem>>, vector<1x1024xf32>,
    %c5_148 = arith.constant 5 : index
    %c0_149 = arith.constant 0 : index
    %305 = vector.load %arg3[%c5_148, %c0_149] : memref<8x1024xf32, #tpu.memory_space<vmem>>, vector<1x1024xf32>
    tpu.vector_store %arg3[%c5_148, %c0_149], %296 {strides = array<i32>} : memref<8x1024xf32, #tpu.memory_space<vmem>>, vector<1x1024xf32>,
    %c6_150 = arith.constant 6 : index
    %c0_151 = arith.constant 0 : index
    %306 = vector.load %arg3[%c6_150, %c0_151] : memref<8x1024xf32, #tpu.memory_space<vmem>>, vector<1x1024xf32>
    tpu.vector_store %arg3[%c6_150, %c0_151], %281 {strides = array<i32>} : memref<8x1024xf32, #tpu.memory_space<vmem>>, vector<1x1024xf32>,
    %cst_152 = arith.constant 0.000000e+00 : f32
    %307 = vector.broadcast %cst_152 : f32 to vector<1x1024xf32>
    %c7_153 = arith.constant 7 : index
    %c0_154 = arith.constant 0 : index
    %308 = vector.load %arg3[%c7_153, %c0_154] : memref<8x1024xf32, #tpu.memory_space<vmem>>, vector<1x1024xf32>
    tpu.vector_store %arg3[%c7_153, %c0_154], %307 {strides = array<i32>} : memref<8x1024xf32, #tpu.memory_space<vmem>>, vector<1x1024xf32>,
    return
  }
  func.func @transform_0(%arg0: i32) -> (i32, i32) {
    %c0_i32 = arith.constant 0 : i32
    %c0_i32_0 = arith.constant 0 : i32
    return %c0_i32, %arg0 : i32, i32
  }
  func.func @transform_1(%arg0: i32) -> (i32, i32) {
    %c0_i32 = arith.constant 0 : i32
    %c0_i32_0 = arith.constant 0 : i32
    return %c0_i32, %arg0 : i32, i32
  }
  func.func @transform_2(%arg0: i32) -> (i32, i32) {
    %c0_i32 = arith.constant 0 : i32
    %c0_i32_0 = arith.constant 0 : i32
    return %c0_i32, %arg0 : i32, i32
  }
}

</mosaic_0001>

<bundles_post_ra>
// kernel: _forward_impl.1
= control target key start
LH: loop header
LB: loop body
LE: loop exit
PB: predicated region body
PF: predicated region fallthrough
CT: control target
= control target key end

     0   :  { %v683_v1 = vmov 0.0   ;;  %s1217_s1 = inlined_call_operand.vmem [shape: f32[76,1024], index: 1, kind: input, shape index: {}]   ;;  %s1218_s2 = inlined_call_operand.vmem [shape: f32[8,1024], index: 2, kind: output, shape index: {}]   ;;  %s1219_s0 = inlined_call_operand.vmem [shape: f32[3,1024], index: 0, kind: input, shape index: {}]  }
   0x1   :  { %v16_v0 = vld [vmem:[%s1217_s1] ss:$8 sm:$0xf]  ;;  %680 = vst [vmem:[%s1218_s2 + $0x7] ss:$8 sm:$0xf] %v683_v1 }
   0x2   :  { %681 = vst [vmem:[%s1218_s2 + $0x7] ss:$8 sm:$0xf0] %v683_v1  ;;  %v17_v2 = vld [vmem:[%s1217_s1] ss:$8 sm:$0xf0] }
   0x3   :  { %v515_v3 = vld [vmem:[%s1217_s1 + $0xc0] ss:$8 sm:$0xf]  ;;  %v18_v4 = vor.u32 %v17_v2, %v16_v0  ;;  %v517_v6 = vld [vmem:[%s1217_s1 + $0x1] ss:$8 sm:$0xf] }
   0x4   :  { %v516_v5 = vld [vmem:[%s1217_s1 + $0xc0] ss:$8 sm:$0xf0]  ;;  %v518_v8 = vld [vmem:[%s1217_s1 + $0x1] ss:$8 sm:$0xf0] }
   0x5   :  { %v22_v7 = vor.u32 %v516_v5, %v515_v3  ;;  %v519_v9 = vld [vmem:[%s1217_s1 + $0xc1] ss:$8 sm:$0xf]  ;;  %v26_v10 = vor.u32 %v518_v8, %v517_v6  ;;  %v521_v12 = vld [vmem:[%s1217_s1 + $0x2] ss:$8 sm:$0xf] }
   0x6   :  { %v520_v11 = vld [vmem:[%s1217_s1 + $0xc1] ss:$8 sm:$0xf0]  ;;  %v522_v14 = vld [vmem:[%s1217_s1 + $0x2] ss:$8 sm:$0xf0] }
   0x7   :  { %v33_v13 = vor.u32 %v520_v11, %v519_v9  ;;  %v523_v15 = vld [vmem:[%s1217_s1 + $0xc2] ss:$8 sm:$0xf]  ;;  %vm27_vm0 = vcmp.gt.f32.partialorder %v26_v10, %v18_v4  ;;  %v38_v16 = vor.u32 %v522_v14, %v521_v12  ;;  %v525_v18 = vld [vmem:[%s1217_s1 + $0x3] ss:$8 sm:$0xf] }
   0x8   :  { %v524_v17 = vld [vmem:[%s1217_s1 + $0xc2] ss:$8 sm:$0xf0]  ;;  %v28_v19 = vsel %vm27_vm0, %v26_v10, %v18_v4  ;;  %v29_v20 = vsel %vm27_vm0, 1.0, %v683_v1 }
   0x9   :  { %v34_v21 = vsel %vm27_vm0, %v33_v13, %v22_v7  ;;  %v45_v22 = vor.u32 %v524_v17, %v523_v15  ;;  %v526_v23 = vld [vmem:[%s1217_s1 + $0x3] ss:$8 sm:$0xf0]  ;;  %vm39_vm1 = vcmp.gt.f32.partialorder %v38_v16, %v28_v19  ;;  %v529_v31 = vld [vmem:[%s1217_s1 + $0x4] ss:$8 sm:$0xf] }
   0xa   :  { %v50_v24 = vor.u32 %v526_v23, %v525_v18  ;;  %v527_v25 = vld [vmem:[%s1217_s1 + $0xc3] ss:$8 sm:$0xf]  ;;  %v40_v27 = vsel %vm39_vm1, %v38_v16, %v28_v19  ;;  %v41_v28 = vsel %vm39_vm1, 2.0, %v29_v20 }
   0xb   :  { %v528_v26 = vld [vmem:[%s1217_s1 + $0xc3] ss:$8 sm:$0xf0]  ;;  %v46_v29 = vsel %vm39_vm1, %v45_v22, %v34_v21  ;;  %v530_v32 = vld [vmem:[%s1217_s1 + $0x4] ss:$8 sm:$0xf0] }
   0xc   :  { %v57_v30 = vor.u32 %v528_v26, %v527_v25  ;;  %vm51_vm2 = vcmp.gt.f32.partialorder %v50_v24, %v40_v27  ;;  %v531_v33 = vld [vmem:[%s1217_s1 + $0xc4] ss:$8 sm:$0xf]  ;;  %v62_v37 = vor.u32 %v530_v32, %v529_v31  ;;  %v533_v40 = vld [vmem:[%s1217_s1 + $0x5] ss:$8 sm:$0xf] }
   0xd   :  { %v52_v34 = vsel %vm51_vm2, %v50_v24, %v40_v27  ;;  %v53_v35 = vsel %vm51_vm2, 3.0, %v41_v28  ;;  %v532_v38 = vld [vmem:[%s1217_s1 + $0xc4] ss:$8 sm:$0xf0] }
   0xe   :  { %v58_v36 = vsel %vm51_vm2, %v57_v30, %v46_v29  ;;  %v69_v39 = vor.u32 %v532_v38, %v531_v33  ;;  %v534_v41 = vld [vmem:[%s1217_s1 + $0x5] ss:$8 sm:$0xf0]  ;;  %vm63_vm3 = vcmp.gt.f32.partialorder %v62_v37, %v52_v34  ;;  %v537_v49 = vld [vmem:[%s1217_s1 + $0x6] ss:$8 sm:$0xf] }
   0xf   :  { %v74_v42 = vor.u32 %v534_v41, %v533_v40  ;;  %v535_v43 = vld [vmem:[%s1217_s1 + $0xc5] ss:$8 sm:$0xf]  ;;  %v64_v45 = vsel %vm63_vm3, %v62_v37, %v52_v34  ;;  %v65_v46 = vsel %vm63_vm3, 4.0, %v53_v35 }
  0x10   :  { %v536_v44 = vld [vmem:[%s1217_s1 + $0xc5] ss:$8 sm:$0xf0]  ;;  %v70_v47 = vsel %vm63_vm3, %v69_v39, %v58_v36  ;;  %v538_v50 = vld [vmem:[%s1217_s1 + $0x6] ss:$8 sm:$0xf0] }
  0x11   :  { %v81_v48 = vor.u32 %v536_v44, %v535_v43  ;;  %vm75_vm4 = vcmp.gt.f32.partialorder %v74_v42, %v64_v45  ;;  %v539_v51 = vld [vmem:[%s1217_s1 + $0xc6] ss:$8 sm:$0xf]  ;;  %v86_v55 = vor.u32 %v538_v50, %v537_v49  ;;  %v541_v58 = vld [vmem:[%s1217_s1 + $0x7] ss:$8 sm:$0xf] }
  0x12   :  { %v76_v52 = vsel %vm75_vm4, %v74_v42, %v64_v45  ;;  %v77_v53 = vsel %vm75_vm4, 5.0, %v65_v46  ;;  %v540_v56 = vld [vmem:[%s1217_s1 + $0xc6] ss:$8 sm:$0xf0]  ;;  %v513_v45 = vld [vmem:[%s1219_s0 + $0x1] ss:$4 sm:$0xff] }
  0x13   :  { %v82_v54 = vsel %vm75_vm4, %v81_v48, %v70_v47  ;;  %v93_v57 = vor.u32 %v540_v56, %v539_v51  ;;  %v542_v59 = vld [vmem:[%s1217_s1 + $0x7] ss:$8 sm:$0xf0]  ;;  %vm87_vm5 = vcmp.gt.f32.partialorder %v86_v55, %v76_v52  ;;  %v545_v4 = vld [vmem:[%s1217_s1 + $0x40] ss:$8 sm:$0xf] }
  0x14   :  { %v98_v60 = vor.u32 %v542_v59, %v541_v58  ;;  %v543_v61 = vld [vmem:[%s1217_s1 + $0xc7] ss:$8 sm:$0xf]  ;;  %v88_v63 = vsel %vm87_vm5, %v86_v55, %v76_v52  ;;  %v89_v0 = vsel %vm87_vm5, 6.0, %v77_v53  ;;  %v11_v58 = vld [vmem:[%s1219_s0] ss:$4 sm:$0xff] }
  0x15   :  { %v544_v62 = vld [vmem:[%s1217_s1 + $0xc7] ss:$8 sm:$0xf0]  ;;  %v94_v2 = vsel %vm87_vm5, %v93_v57, %v82_v54  ;;  %v546_v5 = vld [vmem:[%s1217_s1 + $0x40] ss:$8 sm:$0xf0] }
  0x16   :  { %v105_v3 = vor.u32 %v544_v62, %v543_v61  ;;  %vm99_vm6 = vcmp.gt.f32.partialorder %v98_v60, %v88_v63  ;;  %v547_v6 = vld [vmem:[%s1217_s1 + $0x100] ss:$8 sm:$0xf]  ;;  %v110_v10 = vor.u32 %v546_v5, %v545_v4  ;;  %v549_v13 = vld [vmem:[%s1217_s1 + $0x41] ss:$8 sm:$0xf] }
  0x17   :  { %v100_v7 = vsel %vm99_vm6, %v98_v60, %v88_v63  ;;  %v101_v8 = vsel %vm99_vm6, 7.0, %v89_v0  ;;  %v548_v11 = vld [vmem:[%s1217_s1 + $0x100] ss:$8 sm:$0xf0] }
  0x18   :  { %v106_v9 = vsel %vm99_vm6, %v105_v3, %v94_v2  ;;  %v117_v12 = vor.u32 %v548_v11, %v547_v6  ;;  %v550_v14 = vld [vmem:[%s1217_s1 + $0x41] ss:$8 sm:$0xf0]  ;;  %vm111_vm7 = vcmp.gt.f32.partialorder %v110_v10, %v100_v7  ;;  %v553_v22 = vld [vmem:[%s1217_s1 + $0x42] ss:$8 sm:$0xf] }
  0x19   :  { %v122_v15 = vor.u32 %v550_v14, %v549_v13  ;;  %v551_v16 = vld [vmem:[%s1217_s1 + $0x101] ss:$8 sm:$0xf]  ;;  %v112_v18 = vsel %vm111_vm7, %v110_v10, %v100_v7  ;;  %v113_v19 = vsel %vm111_vm7, 8.0, %v101_v8 }
  0x1a   :  { %v552_v17 = vld [vmem:[%s1217_s1 + $0x101] ss:$8 sm:$0xf0]  ;;  %v118_v20 = vsel %vm111_vm7, %v117_v12, %v106_v9  ;;  %v554_v23 = vld [vmem:[%s1217_s1 + $0x42] ss:$8 sm:$0xf0] }
  0x1b   :  { %v129_v21 = vor.u32 %v552_v17, %v551_v16  ;;  %vm123_vm8 = vcmp.gt.f32.partialorder %v122_v15, %v112_v18  ;;  %v555_v24 = vld [vmem:[%s1217_s1 + $0x102] ss:$8 sm:$0xf]  ;;  %v134_v28 = vor.u32 %v554_v23, %v553_v22  ;;  %v557_v31 = vld [vmem:[%s1217_s1 + $0x43] ss:$8 sm:$0xf] }
  0x1c   :  { %v124_v25 = vsel %vm123_vm8, %v122_v15, %v112_v18  ;;  %v125_v26 = vsel %vm123_vm8, 9.0, %v113_v19  ;;  %v556_v29 = vld [vmem:[%s1217_s1 + $0x102] ss:$8 sm:$0xf0] }
  0x1d   :  { %v130_v27 = vsel %vm123_vm8, %v129_v21, %v118_v20  ;;  %v141_v30 = vor.u32 %v556_v29, %v555_v24  ;;  %v558_v32 = vld [vmem:[%s1217_s1 + $0x43] ss:$8 sm:$0xf0]  ;;  %vm135_vm9 = vcmp.gt.f32.partialorder %v134_v28, %v124_v25  ;;  %v611_v40 = vld [vmem:[%s1217_s1 + $0x180] ss:$8 sm:$0xf] }
  0x1e   :  { %v146_v33 = vor.u32 %v558_v32, %v557_v31  ;;  %v559_v34 = vld [vmem:[%s1217_s1 + $0x103] ss:$8 sm:$0xf]  ;;  %v136_v36 = vsel %vm135_vm9, %v134_v28, %v124_v25  ;;  %v137_v37 = vsel %vm135_vm9, 10.0, %v125_v26 }
  0x1f   :  { %v560_v35 = vld [vmem:[%s1217_s1 + $0x103] ss:$8 sm:$0xf0]  ;;  %v142_v38 = vsel %vm135_vm9, %v141_v30, %v130_v27  ;;  %v612_v41 = vld [vmem:[%s1217_s1 + $0x180] ss:$8 sm:$0xf0] }
  0x20   :  { %v152_v39 = vor.u32 %v560_v35, %v559_v34  ;;  %vm147_vm10 = vcmp.gt.f32.partialorder %v146_v33, %v136_v36  ;;  %v662_v42 = vld [vmem:[%s1217_s1 + $0x241] ss:$8 sm:$0xf]  ;;  %v306_v46 = vor.u32 %v612_v41, %v611_v40  ;;  %v561_v50 = vld [vmem:[%s1217_s1 + $0x44] ss:$8 sm:$0xf] }
  0x21   :  { %v148_v43 = vsel %vm147_vm10, 11.0, %v137_v37  ;;  %v663_v47 = vld [vmem:[%s1217_s1 + $0x241] ss:$8 sm:$0xf0] }
  0x22   :  { %v153_v44 = vsel %vm147_vm10, %v152_v39, %v142_v38  ;;  %v293_v48 = vadd.f32 0.5, %v148_v43  ;;  %v472_v49 = vor.u32 %v663_v47, %v662_v42  ;;  %v562_v51 = vld [vmem:[%s1217_s1 + $0x44] ss:$8 sm:$0xf0]  ;;  %v307_v54 = vadd.f32 %v513_v45, %v306_v46 }
  0x23   :  { %v563_v52 = vld [vmem:[%s1217_s1 + $0x104] ss:$8 sm:$0xf]  ;;  %v157_v56 = vor.u32 %v562_v51, %v561_v50  ;;  %v565_v59 = vld [vmem:[%s1217_s1 + $0x45] ss:$8 sm:$0xf] }
  0x24   :  { %v294_v53 = vadd.f32 %v293_v48, %v153_v44  ;;  %v473_v55 = vadd.f32 1.0, %v472_v49  ;;  %v564_v57 = vld [vmem:[%s1217_s1 + $0x104] ss:$8 sm:$0xf0] }
  0x25   :  { %v566_v60 = vld [vmem:[%s1217_s1 + $0x45] ss:$8 sm:$0xf0]  ;;  %v161_v63 = vor.u32 %v564_v57, %v563_v52  ;;  %v569_v4 = vld [vmem:[%s1217_s1 + $0x46] ss:$8 sm:$0xf] }
  0x26   :  { %v295_v61 = vmul.f32 0.5, %v294_v53  ;;  %v484_v62 = vmul.f32 0.5, %v473_v55  ;;  %672 = vst [vmem:[%s1218_s2 + $0x3] ss:$8 sm:$0xf] %v473_v55  ;;  %v165_v0 = vor.u32 %v566_v60, %v565_v59 }
  0x27   :  { %673 = vst [vmem:[%s1218_s2 + $0x3] ss:$8 sm:$0xf0] %v473_v55  ;;  %v567_v2 = vld [vmem:[%s1217_s1 + $0x105] ss:$8 sm:$0xf] }
  0x28   :  { %v568_v3 = vld [vmem:[%s1217_s1 + $0x105] ss:$8 sm:$0xf0]  ;;  %v609_v5 = vadd.f32 -3.0, %v295_v61  ;;  %v485_v6 = vadd.f32 %v484_v62, %v307_v54  ;;  %vm166_vm11 = vcmp.gt.f32.partialorder %v165_v0, %v157_v56 }
  0x29   :  { %v172_v7 = vor.u32 %v568_v3, %v567_v2  ;;  %v570_v8 = vld [vmem:[%s1217_s1 + $0x46] ss:$8 sm:$0xf0]  ;;  %v167_v9 = vsel %vm166_vm11, %v165_v0, %v157_v56  ;;  %v168_v10 = vsel %vm166_vm11, 1.0, %v683_v1 }
  0x2a   :  { %v177_v11 = vor.u32 %v570_v8, %v569_v4  ;;  %v571_v12 = vld [vmem:[%s1217_s1 + $0x106] ss:$8 sm:$0xf]  ;;  %v297_v13 = vadd.f32 %v609_v5, %v11_v58  ;;  %668 = vst [vmem:[%s1218_s2 + $0x1] ss:$8 sm:$0xf] %v485_v6 }
  0x2b   :  { %669 = vst [vmem:[%s1218_s2 + $0x1] ss:$8 sm:$0xf0] %v485_v6  ;;  %v173_v14 = vsel %vm166_vm11, %v172_v7, %v161_v63  ;;  %v572_v15 = vld [vmem:[%s1217_s1 + $0x106] ss:$8 sm:$0xf0] }
  0x2c   :  { %v573_v16 = vld [vmem:[%s1217_s1 + $0x47] ss:$8 sm:$0xf]  ;;  %vm178_vm12 = vcmp.gt.f32.partialorder %v177_v11, %v167_v9  ;;  %v184_v17 = vor.u32 %v572_v15, %v571_v12  ;;  %486 = vst [vmem:[%s1218_s2] ss:$8 sm:$0xf] %v297_v13 }
  0x2d   :  { %v574_v18 = vld [vmem:[%s1217_s1 + $0x47] ss:$8 sm:$0xf0]  ;;  %487 = vst [vmem:[%s1218_s2] ss:$8 sm:$0xf0] %v297_v13  ;;  %v179_v20 = vsel %vm178_vm12, %v177_v11, %v167_v9  ;;  %v180_v21 = vsel %vm178_vm12, 2.0, %v168_v10 }
  0x2e   :  { %v575_v19 = vld [vmem:[%s1217_s1 + $0x107] ss:$8 sm:$0xf]  ;;  %v189_v22 = vor.u32 %v574_v18, %v573_v16  ;;  %v185_v24 = vsel %vm178_vm12, %v184_v17, %v173_v14  ;;  %v577_v26 = vld [vmem:[%s1217_s1 + $0x80] ss:$8 sm:$0xf] }
  0x2f   :  { %v576_v23 = vld [vmem:[%s1217_s1 + $0x107] ss:$8 sm:$0xf0]  ;;  %v578_v27 = vld [vmem:[%s1217_s1 + $0x80] ss:$8 sm:$0xf0] }
  0x30   :  { %v196_v25 = vor.u32 %v576_v23, %v575_v19  ;;  %vm190_vm13 = vcmp.gt.f32.partialorder %v189_v22, %v179_v20  ;;  %v201_v28 = vor.u32 %v578_v27, %v577_v26  ;;  %v579_v29 = vld [vmem:[%s1217_s1 + $0x140] ss:$8 sm:$0xf]  ;;  %v581_v35 = vld [vmem:[%s1217_s1 + $0x81] ss:$8 sm:$0xf] }
  0x31   :  { %v580_v30 = vld [vmem:[%s1217_s1 + $0x140] ss:$8 sm:$0xf0]  ;;  %v191_v31 = vsel %vm190_vm13, %v189_v22, %v179_v20  ;;  %v192_v32 = vsel %vm190_vm13, 3.0, %v180_v21 }
  0x32   :  { %v197_v33 = vsel %vm190_vm13, %v196_v25, %v185_v24  ;;  %v208_v34 = vor.u32 %v580_v30, %v579_v29  ;;  %vm202_vm14 = vcmp.gt.f32.partialorder %v201_v28, %v191_v31  ;;  %v582_v36 = vld [vmem:[%s1217_s1 + $0x81] ss:$8 sm:$0xf0]  ;;  %v585_v44 = vld [vmem:[%s1217_s1 + $0x82] ss:$8 sm:$0xf] }
  0x33   :  { %v583_v37 = vld [vmem:[%s1217_s1 + $0x141] ss:$8 sm:$0xf]  ;;  %v203_v38 = vsel %vm202_vm14, %v201_v28, %v191_v31  ;;  %v204_v39 = vsel %vm202_vm14, 4.0, %v192_v32  ;;  %v213_v41 = vor.u32 %v582_v36, %v581_v35 }
  0x34   :  { %v209_v40 = vsel %vm202_vm14, %v208_v34, %v197_v33  ;;  %v584_v42 = vld [vmem:[%s1217_s1 + $0x141] ss:$8 sm:$0xf0]  ;;  %v586_v45 = vld [vmem:[%s1217_s1 + $0x82] ss:$8 sm:$0xf0] }
  0x35   :  { %v220_v43 = vor.u32 %v584_v42, %v583_v37  ;;  %vm214_vm15 = vcmp.gt.f32.partialorder %v213_v41, %v203_v38  ;;  %v225_v46 = vor.u32 %v586_v45, %v585_v44  ;;  %v587_v47 = vld [vmem:[%s1217_s1 + $0x142] ss:$8 sm:$0xf]  ;;  %v589_v53 = vld [vmem:[%s1217_s1 + $0x83] ss:$8 sm:$0xf] }
  0x36   :  { %v588_v48 = vld [vmem:[%s1217_s1 + $0x142] ss:$8 sm:$0xf0]  ;;  %v215_v49 = vsel %vm214_vm15, %v213_v41, %v203_v38  ;;  %v216_v50 = vsel %vm214_vm15, 5.0, %v204_v39 }
  0x37   :  { %v221_v51 = vsel %vm214_vm15, %v220_v43, %v209_v40  ;;  %v232_v52 = vor.u32 %v588_v48, %v587_v47  ;;  %vm226_vm0 = vcmp.gt.f32.partialorder %v225_v46, %v215_v49  ;;  %v590_v54 = vld [vmem:[%s1217_s1 + $0x83] ss:$8 sm:$0xf0]  ;;  %v593_v62 = vld [vmem:[%s1217_s1 + $0x84] ss:$8 sm:$0xf] }
  0x38   :  { %v591_v55 = vld [vmem:[%s1217_s1 + $0x143] ss:$8 sm:$0xf]  ;;  %v227_v56 = vsel %vm226_vm0, %v225_v46, %v215_v49  ;;  %v228_v57 = vsel %vm226_vm0, 6.0, %v216_v50  ;;  %v237_v59 = vor.u32 %v590_v54, %v589_v53 }
  0x39   :  { %v233_v58 = vsel %vm226_vm0, %v232_v52, %v221_v51  ;;  %v592_v60 = vld [vmem:[%s1217_s1 + $0x143] ss:$8 sm:$0xf0]  ;;  %v594_v63 = vld [vmem:[%s1217_s1 + $0x84] ss:$8 sm:$0xf0] }
  0x3a   :  { %v244_v61 = vor.u32 %v592_v60, %v591_v55  ;;  %vm238_vm1 = vcmp.gt.f32.partialorder %v237_v59, %v227_v56  ;;  %v249_v0 = vor.u32 %v594_v63, %v593_v62  ;;  %v595_v2 = vld [vmem:[%s1217_s1 + $0x144] ss:$8 sm:$0xf]  ;;  %v597_v8 = vld [vmem:[%s1217_s1 + $0x85] ss:$8 sm:$0xf] }
  0x3b   :  { %v596_v3 = vld [vmem:[%s1217_s1 + $0x144] ss:$8 sm:$0xf0]  ;;  %v239_v4 = vsel %vm238_vm1, %v237_v59, %v227_v56  ;;  %v240_v5 = vsel %vm238_vm1, 7.0, %v228_v57  ;;  %v514_v56 = vld [vmem:[%s1219_s0 + $0x2] ss:$4 sm:$0xff] }
  0x3c   :  { %v245_v6 = vsel %vm238_vm1, %v244_v61, %v233_v58  ;;  %v256_v7 = vor.u32 %v596_v3, %v595_v2  ;;  %vm250_vm2 = vcmp.gt.f32.partialorder %v249_v0, %v239_v4  ;;  %v598_v9 = vld [vmem:[%s1217_s1 + $0x85] ss:$8 sm:$0xf0]  ;;  %v601_v17 = vld [vmem:[%s1217_s1 + $0x86] ss:$8 sm:$0xf] }
  0x3d   :  { %v599_v10 = vld [vmem:[%s1217_s1 + $0x145] ss:$8 sm:$0xf]  ;;  %v251_v11 = vsel %vm250_vm2, %v249_v0, %v239_v4  ;;  %v252_v12 = vsel %vm250_vm2, 8.0, %v240_v5  ;;  %v261_v14 = vor.u32 %v598_v9, %v597_v8 }
  0x3e   :  { %v257_v13 = vsel %vm250_vm2, %v256_v7, %v245_v6  ;;  %v600_v15 = vld [vmem:[%s1217_s1 + $0x145] ss:$8 sm:$0xf0]  ;;  %v602_v18 = vld [vmem:[%s1217_s1 + $0x86] ss:$8 sm:$0xf0] }
  0x3f   :  { %v268_v16 = vor.u32 %v600_v15, %v599_v10  ;;  %vm262_vm3 = vcmp.gt.f32.partialorder %v261_v14, %v251_v11  ;;  %v273_v19 = vor.u32 %v602_v18, %v601_v17  ;;  %v603_v20 = vld [vmem:[%s1217_s1 + $0x146] ss:$8 sm:$0xf]  ;;  %v605_v26 = vld [vmem:[%s1217_s1 + $0x87] ss:$8 sm:$0xf] }
  0x40   :  { %v604_v21 = vld [vmem:[%s1217_s1 + $0x146] ss:$8 sm:$0xf0]  ;;  %v263_v22 = vsel %vm262_vm3, %v261_v14, %v251_v11  ;;  %v264_v23 = vsel %vm262_vm3, 9.0, %v252_v12 }
  0x41   :  { %v269_v24 = vsel %vm262_vm3, %v268_v16, %v257_v13  ;;  %v280_v25 = vor.u32 %v604_v21, %v603_v20  ;;  %vm274_vm4 = vcmp.gt.f32.partialorder %v273_v19, %v263_v22  ;;  %v606_v27 = vld [vmem:[%s1217_s1 + $0x87] ss:$8 sm:$0xf0]  ;;  %v664_v35 = vld [vmem:[%s1217_s1 + $0x242] ss:$8 sm:$0xf] }
  0x42   :  { %v607_v28 = vld [vmem:[%s1217_s1 + $0x147] ss:$8 sm:$0xf]  ;;  %v275_v29 = vsel %vm274_vm4, %v273_v19, %v263_v22  ;;  %v276_v30 = vsel %vm274_vm4, 10.0, %v264_v23  ;;  %v285_v32 = vor.u32 %v606_v27, %v605_v26 }
  0x43   :  { %v281_v31 = vsel %vm274_vm4, %v280_v25, %v269_v24  ;;  %v608_v33 = vld [vmem:[%s1217_s1 + $0x147] ss:$8 sm:$0xf0]  ;;  %v665_v36 = vld [vmem:[%s1217_s1 + $0x242] ss:$8 sm:$0xf0] }
  0x44   :  { %v291_v34 = vor.u32 %v608_v33, %v607_v28  ;;  %vm286_vm5 = vcmp.gt.f32.partialorder %v285_v32, %v275_v29  ;;  %v477_v37 = vor.u32 %v665_v36, %v664_v35  ;;  %v666_v38 = vld [vmem:[%s1217_s1 + $0x243] ss:$8 sm:$0xf]  ;;  %v613_v43 = vld [vmem:[%s1217_s1 + $0x181] ss:$8 sm:$0xf] }
  0x45   :  { %v667_v39 = vld [vmem:[%s1217_s1 + $0x243] ss:$8 sm:$0xf0]  ;;  %v287_v40 = vsel %vm286_vm5, 11.0, %v276_v30 }
  0x46   :  { %v292_v41 = vsel %vm286_vm5, %v291_v34, %v281_v31  ;;  %v482_v42 = vor.u32 %v667_v39, %v666_v38  ;;  %v298_v44 = vadd.f32 0.5, %v287_v40  ;;  %v478_v45 = vadd.f32 1.0, %v477_v37  ;;  %v614_v46 = vld [vmem:[%s1217_s1 + $0x181] ss:$8 sm:$0xf0] }
  0x47   :  { %v615_v48 = vld [vmem:[%s1217_s1 + $0x1c5] ss:$8 sm:$0xf]  ;;  %v311_v50 = vor.u32 %v614_v46, %v613_v43  ;;  %v617_v52 = vld [vmem:[%s1217_s1 + $0x182] ss:$8 sm:$0xf] }
  0x48   :  { %v483_v47 = vadd.f32 1.0, %v482_v42  ;;  %v299_v49 = vadd.f32 %v298_v44, %v292_v41  ;;  %674 = vst [vmem:[%s1218_s2 + $0x4] ss:$8 sm:$0xf] %v478_v45 }
  0x49   :  { %675 = vst [vmem:[%s1218_s2 + $0x4] ss:$8 sm:$0xf0] %v478_v45  ;;  %v616_v51 = vld [vmem:[%s1217_s1 + $0x1c5] ss:$8 sm:$0xf0] }
  0x4a   :  { %676 = vst [vmem:[%s1218_s2 + $0x5] ss:$8 sm:$0xf] %v483_v47  ;;  %677 = vst [vmem:[%s1218_s2 + $0x5] ss:$8 sm:$0xf0] %v483_v47  ;;  %v315_v53 = vor.u32 %v616_v51, %v615_v48 }
  0x4b   :  { %v618_v54 = vld [vmem:[%s1217_s1 + $0x182] ss:$8 sm:$0xf0]  ;;  %v619_v55 = vld [vmem:[%s1217_s1 + $0x1c6] ss:$8 sm:$0xf] }
  0x4c   :  { %v300_v57 = vmul.f32 0.5, %v299_v49  ;;  %v319_v58 = vor.u32 %v618_v54, %v617_v52  ;;  %v620_v59 = vld [vmem:[%s1217_s1 + $0x1c6] ss:$8 sm:$0xf0] }
  0x4d   :  { %v326_v60 = vor.u32 %v620_v59, %v619_v55  ;;  %v621_v61 = vld [vmem:[%s1217_s1 + $0x183] ss:$8 sm:$0xf]  ;;  %v623_v2 = vld [vmem:[%s1217_s1 + $0x1c7] ss:$8 sm:$0xf] }
  0x4e   :  { %v622_v62 = vld [vmem:[%s1217_s1 + $0x183] ss:$8 sm:$0xf0]  ;;  %v610_v63 = vadd.f32 -3.0, %v300_v57  ;;  %vm320_vm6 = vcmp.gt.f32.partialorder %v319_v58, %v311_v50 }
  0x4f   :  { %v331_v0 = vor.u32 %v622_v62, %v621_v61  ;;  %v321_v3 = vsel %vm320_vm6, %v319_v58, %v311_v50  ;;  %v322_v4 = vsel %vm320_vm6, 1.0, %v683_v1  ;;  %v327_v5 = vsel %vm320_vm6, %v326_v60, %v315_v53  ;;  %v624_v6 = vld [vmem:[%s1217_s1 + $0x1c7] ss:$8 sm:$0xf0] }
  0x50   :  { %v302_v7 = vadd.f32 %v610_v63, %v514_v56  ;;  %v338_v8 = vor.u32 %v624_v6, %v623_v2  ;;  %v625_v9 = vld [vmem:[%s1217_s1 + $0x184] ss:$8 sm:$0xf]  ;;  %v627_v1 = vld [vmem:[%s1217_s1 + $0x200] ss:$8 sm:$0xf] }
  0x51   :  { %vm332_vm7 = vcmp.gt.f32.partialorder %v331_v0, %v321_v3  ;;  %v626_v10 = vld [vmem:[%s1217_s1 + $0x184] ss:$8 sm:$0xf0]  ;;  %v628_v15 = vld [vmem:[%s1217_s1 + $0x200] ss:$8 sm:$0xf0] }
  0x52   :  { %v333_v11 = vsel %vm332_vm7, %v331_v0, %v321_v3  ;;  %v334_v12 = vsel %vm332_vm7, 2.0, %v322_v4  ;;  %v343_v13 = vor.u32 %v626_v10, %v625_v9  ;;  %670 = vst [vmem:[%s1218_s2 + $0x2] ss:$8 sm:$0xf] %v302_v7  ;;  %v339_v14 = vsel %vm332_vm7, %v338_v8, %v327_v5 }
  0x53   :  { %671 = vst [vmem:[%s1218_s2 + $0x2] ss:$8 sm:$0xf0] %v302_v7  ;;  %v629_v16 = vld [vmem:[%s1217_s1 + $0x185] ss:$8 sm:$0xf]  ;;  %v350_v17 = vor.u32 %v628_v15, %v627_v1 }
  0x54   :  { %vm344_vm8 = vcmp.gt.f32.partialorder %v343_v13, %v333_v11  ;;  %v630_v18 = vld [vmem:[%s1217_s1 + $0x185] ss:$8 sm:$0xf0]  ;;  %v631_v19 = vld [vmem:[%s1217_s1 + $0x201] ss:$8 sm:$0xf] }
  0x55   :  { %v345_v20 = vsel %vm344_vm8, %v343_v13, %v333_v11  ;;  %v346_v21 = vsel %vm344_vm8, 3.0, %v334_v12  ;;  %v355_v22 = vor.u32 %v630_v18, %v629_v16  ;;  %v632_v23 = vld [vmem:[%s1217_s1 + $0x201] ss:$8 sm:$0xf0]  ;;  %v351_v24 = vsel %vm344_vm8, %v350_v17, %v339_v14 }
  0x56   :  { %v362_v25 = vor.u32 %v632_v23, %v631_v19  ;;  %v633_v26 = vld [vmem:[%s1217_s1 + $0x186] ss:$8 sm:$0xf]  ;;  %v635_v29 = vld [vmem:[%s1217_s1 + $0x202] ss:$8 sm:$0xf] }
  0x57   :  { %v634_v27 = vld [vmem:[%s1217_s1 + $0x186] ss:$8 sm:$0xf0]  ;;  %vm356_vm9 = vcmp.gt.f32.partialorder %v355_v22, %v345_v20  ;;  %v636_v30 = vld [vmem:[%s1217_s1 + $0x202] ss:$8 sm:$0xf0] }
  0x58   :  { %v367_v28 = vor.u32 %v634_v27, %v633_v26  ;;  %v357_v31 = vsel %vm356_vm9, %v355_v22, %v345_v20  ;;  %v358_v32 = vsel %vm356_vm9, 4.0, %v346_v21  ;;  %v363_v33 = vsel %vm356_vm9, %v362_v25, %v351_v24  ;;  %v637_v35 = vld [vmem:[%s1217_s1 + $0x187] ss:$8 sm:$0xf] }
  0x59   :  { %v374_v34 = vor.u32 %v636_v30, %v635_v29  ;;  %v638_v36 = vld [vmem:[%s1217_s1 + $0x187] ss:$8 sm:$0xf0]  ;;  %v639_v37 = vld [vmem:[%s1217_s1 + $0x203] ss:$8 sm:$0xf] }
  0x5a   :  { %vm368_vm10 = vcmp.gt.f32.partialorder %v367_v28, %v357_v31  ;;  %v379_v41 = vor.u32 %v638_v36, %v637_v35  ;;  %v640_v42 = vld [vmem:[%s1217_s1 + $0x203] ss:$8 sm:$0xf0]  ;;  %v641_v44 = vld [vmem:[%s1217_s1 + $0x1c0] ss:$8 sm:$0xf] }
  0x5b   :  { %v369_v38 = vsel %vm368_vm10, %v367_v28, %v357_v31  ;;  %v370_v39 = vsel %vm368_vm10, 5.0, %v358_v32  ;;  %v375_v40 = vsel %vm368_vm10, %v374_v34, %v363_v33  ;;  %v386_v43 = vor.u32 %v640_v42, %v639_v37  ;;  %v642_v45 = vld [vmem:[%s1217_s1 + $0x1c0] ss:$8 sm:$0xf0] }
  0x5c   :  { %vm380_vm11 = vcmp.gt.f32.partialorder %v379_v41, %v369_v38  ;;  %v391_v46 = vor.u32 %v642_v45, %v641_v44  ;;  %v643_v47 = vld [vmem:[%s1217_s1 + $0x204] ss:$8 sm:$0xf]  ;;  %v645_v53 = vld [vmem:[%s1217_s1 + $0x1c1] ss:$8 sm:$0xf] }
  0x5d   :  { %v644_v48 = vld [vmem:[%s1217_s1 + $0x204] ss:$8 sm:$0xf0]  ;;  %v381_v49 = vsel %vm380_vm11, %v379_v41, %v369_v38  ;;  %v382_v50 = vsel %vm380_vm11, 6.0, %v370_v39  ;;  %v387_v51 = vsel %vm380_vm11, %v386_v43, %v375_v40 }
  0x5e   :  { %v398_v52 = vor.u32 %v644_v48, %v643_v47  ;;  %vm392_vm12 = vcmp.gt.f32.partialorder %v391_v46, %v381_v49  ;;  %v646_v54 = vld [vmem:[%s1217_s1 + $0x1c1] ss:$8 sm:$0xf0]  ;;  %v647_v55 = vld [vmem:[%s1217_s1 + $0x205] ss:$8 sm:$0xf] }
  0x5f   :  { %v393_v56 = vsel %vm392_vm12, %v391_v46, %v381_v49  ;;  %v394_v57 = vsel %vm392_vm12, 7.0, %v382_v50  ;;  %v403_v59 = vor.u32 %v646_v54, %v645_v53  ;;  %v648_v60 = vld [vmem:[%s1217_s1 + $0x205] ss:$8 sm:$0xf0] }
  0x60   :  { %v399_v58 = vsel %vm392_vm12, %v398_v52, %v387_v51  ;;  %v410_v61 = vor.u32 %v648_v60, %v647_v55  ;;  %v649_v62 = vld [vmem:[%s1217_s1 + $0x1c2] ss:$8 sm:$0xf]  ;;  %v651_v2 = vld [vmem:[%s1217_s1 + $0x206] ss:$8 sm:$0xf] }
  0x61   :  { %v650_v63 = vld [vmem:[%s1217_s1 + $0x1c2] ss:$8 sm:$0xf0]  ;;  %vm404_vm13 = vcmp.gt.f32.partialorder %v403_v59, %v393_v56  ;;  %v652_v3 = vld [vmem:[%s1217_s1 + $0x206] ss:$8 sm:$0xf0] }
  0x62   :  { %v415_v0 = vor.u32 %v650_v63, %v649_v62  ;;  %v405_v4 = vsel %vm404_vm13, %v403_v59, %v393_v56  ;;  %v406_v5 = vsel %vm404_vm13, 8.0, %v394_v57  ;;  %v411_v6 = vsel %vm404_vm13, %v410_v61, %v399_v58  ;;  %v653_v8 = vld [vmem:[%s1217_s1 + $0x1c3] ss:$8 sm:$0xf] }
  0x63   :  { %v422_v7 = vor.u32 %v652_v3, %v651_v2  ;;  %v654_v9 = vld [vmem:[%s1217_s1 + $0x1c3] ss:$8 sm:$0xf0]  ;;  %v655_v10 = vld [vmem:[%s1217_s1 + $0x207] ss:$8 sm:$0xf] }
  0x64   :  { %vm416_vm14 = vcmp.gt.f32.partialorder %v415_v0, %v405_v4  ;;  %v427_v1 = vor.u32 %v654_v9, %v653_v8  ;;  %v656_v14 = vld [vmem:[%s1217_s1 + $0x207] ss:$8 sm:$0xf0]  ;;  %v657_v16 = vld [vmem:[%s1217_s1 + $0x1c4] ss:$8 sm:$0xf] }
  0x65   :  { %v417_v11 = vsel %vm416_vm14, %v415_v0, %v405_v4  ;;  %v418_v12 = vsel %vm416_vm14, 9.0, %v406_v5  ;;  %v423_v13 = vsel %vm416_vm14, %v422_v7, %v411_v6  ;;  %v434_v15 = vor.u32 %v656_v14, %v655_v10  ;;  %v658_v17 = vld [vmem:[%s1217_s1 + $0x1c4] ss:$8 sm:$0xf0] }
  0x66   :  { %vm428_vm15 = vcmp.gt.f32.partialorder %v427_v1, %v417_v11  ;;  %v439_v18 = vor.u32 %v658_v17, %v657_v16  ;;  %v659_v19 = vld [vmem:[%s1217_s1 + $0x240] ss:$8 sm:$0xf] }
  0x67   :  { %v660_v20 = vld [vmem:[%s1217_s1 + $0x240] ss:$8 sm:$0xf0]  ;;  %v429_v21 = vsel %vm428_vm15, %v427_v1, %v417_v11  ;;  %v430_v22 = vsel %vm428_vm15, 10.0, %v418_v12  ;;  %v435_v23 = vsel %vm428_vm15, %v434_v15, %v423_v13 }
  0x68   :  { %v445_v24 = vor.u32 %v660_v20, %v659_v19  ;;  %vm440_vm0 = vcmp.gt.f32.partialorder %v439_v18, %v429_v21 }
  0x69   :  { %v441_v25 = vsel %vm440_vm0, 11.0, %v430_v22 }
  0x6a   :  { %v446_v26 = vsel %vm440_vm0, %v445_v24, %v435_v23  ;;  %v447_v27 = vmul.f32 0.5235988, %v441_v25 }
  0x6b   :  { %v448_v28 = vmul.f32 0.2617994, %v446_v26 }
  0x6d   :  { %v449_v29 = vadd.f32 %v448_v28, %v447_v27 }
  0x6f   :  { %v450_v30 = vand.u32 2147483647, %v449_v29  ;;  %v459_v35 = vand.u32 2147483648, %v449_v29 }
  0x71   :  { %v452_v31 = vmul.f32 0.15915494, %v450_v30 }
  0x73   :  { %v453_v32 = vfloor.f32 %v452_v31 }
  0x75   :  { %v454_v33 = vmul.f32 6.2831855, %v453_v32 }
  0x77   :  { %v455_v34 = vsub.f32 %v450_v30, %v454_v33 }
  0x79   :  { %vm456_vm1 = vcmp.eq.f32.partialorder %v455_v34, 6.2831855 }
  0x7a   :  { %v457_v36 = vsel %vm456_vm1, 0.0, %v455_v34 }
  0x7b   :  { %v458_v37 = vand.u32 2147483647, %v457_v36 }
  0x7d   :  { %v460_v38 = vor.u32 %v459_v35, %v458_v37 }
  0x7f   :  { %vm461_vm2 = vcmp.ne.f32.partialorder %v460_v38, 0.0  ;;  %vm462_vm3 = vcmp.lt.f32.partialorder %v460_v38, 0.0  ;;  %v464_v39 = vadd.f32 6.2831855, %v460_v38 }
  0x80   :  { %vm463_vm4 = vmand %vm462_vm3, %vm461_vm2 }
  0x81   :  { %v465_v40 = vsel %vm463_vm4, %v464_v39, %v460_v38 }
  0x82   :  { %vm466_vm5 = vcmp.gt.f32.partialorder %v465_v40, 3.1415927  ;;  %v661_v41 = vadd.f32 -6.2831855, %v465_v40 }
  0x84   :  { %v468_v42 = vsel %vm466_vm5, %v661_v41, %v465_v40 }
  0x85   :  { %678 = vst [vmem:[%s1218_s2 + $0x6] ss:$8 sm:$0xf] %v468_v42  ;;  %679 = vst [vmem:[%s1218_s2 + $0x6] ss:$8 sm:$0xf0] %v468_v42 }

</bundles_post_ra>
